<compile_context>
chip_gen: v7x
topology: tpu7x:2x2x1
jax: 0.10.0
libtpu: 0.0.40
codegen_flags: <defaults>
</compile_context>

<pallas_src>
import jax
import jax.numpy as jnp
from jax.experimental import pallas as pl
from jax.experimental.pallas import tpu as pltpu

O_PAD = 128  # lane-dense padded classifier width


# ----------------------------------------------------------------------------
# Fused kernel: num_layers stacked LSTM layers over all T steps + final Linear.
# Everything (inputs, weights, states, hidden sequence) is VMEM/vreg resident.
# ----------------------------------------------------------------------------
def _make_fused_kernel(num_layers, T, H, B):
    def kernel(*refs):
        # refs: x_flat, (w_ih, w_hh, b) * L, w_out, b_out, out
        x_ref = refs[0]                                   # (T*B, I)   row = t*B + b
        layer_refs = refs[1:1 + 3 * num_layers]
        w_out_ref = refs[1 + 3 * num_layers]              # (T*H, O_PAD)
        b_out_ref = refs[2 + 3 * num_layers]              # (1, O_PAD)
        o_ref = refs[3 + 3 * num_layers]                  # (B, O_PAD)

        # Gate-selection lane mask, hoisted out of all loops.
        # PyTorch gate order [i, f, g, o]: tanh on g, sigmoid on i/f/o.
        lane = jax.lax.broadcasted_iota(jnp.int32, (B, 4 * H), 1)
        is_g = (lane >= 2 * H) & (lane < 3 * H)

        o_acc = jnp.zeros((B, O_PAD), jnp.float32)
        layer_in = x_ref[...]                             # (T*B, in_0)

        for l in range(num_layers):
            w_ih = layer_refs[3 * l][...]                 # (in_l, 4H)
            w_hh = layer_refs[3 * l + 1][...]             # (H, 4H)
            bias = layer_refs[3 * l + 2][...]             # (1, 4H)

            # All input projections for this layer in ONE GEMM, bias folded in.
            # This is off the recurrence's serial dependency chain.
            proj = jnp.dot(layer_in, w_ih,
                           preferred_element_type=jnp.float32) + bias  # (T*B, 4H)
            proj_t = [proj[t * B:(t + 1) * B, :] for t in range(T)]

            h = jnp.zeros((B, H), jnp.float32)
            c = jnp.zeros((B, H), jnp.float32)
            h_list = []
            for t in range(T):                            # static unroll, T tiny
                gates = proj_t[t] + jnp.dot(
                    h, w_hh, preferred_element_type=jnp.float32)        # (B, 4H)
                # Whole-vreg activations + lane-mask select (no per-gate
                # sub-lane slicing before the EUP ops).
                act = jnp.where(is_g, jnp.tanh(gates), jax.nn.sigmoid(gates))
                i_g = act[:, 0 * H:1 * H]
                f_g = act[:, 1 * H:2 * H]
                g_g = act[:, 2 * H:3 * H]
                o_g = act[:, 3 * H:4 * H]
                c = f_g * c + i_g * g_g
                h = o_g * jnp.tanh(c)

                if l == num_layers - 1:
                    # Classifier folded into the top layer: consume h_t
                    # directly, no (B, T*H) assembly / tail concat.
                    o_acc = o_acc + jnp.dot(
                        h, w_out_ref[t * H:(t + 1) * H, :],
                        preferred_element_type=jnp.float32)
                else:
                    h_list.append(h)

            if l < num_layers - 1:
                # Stacked hidden sequence (T*B, H), row = t*B + b, feeds the
                # next layer's single input-projection GEMM.  One sublane
                # concat per layer boundary, off the per-step chain.
                layer_in = jnp.concatenate(h_list, axis=0)

        o_ref[...] = (o_acc + b_out_ref[...]).astype(o_ref.dtype)

    return kernel


def forward_pallas(params, x_bti):
    """x_bti: (B, T, I) batch-first. Returns (B, target_size)."""
    B, T, I = x_bti.shape
    layers = params["lstm"]
    L = len(layers)
    H = layers[0]["w_hh"].shape[1]
    O = params["w_out"].shape[0]

    # (T*B, I): row t*B + b holds x[b, t, :], so per-step rows are contiguous.
    x_flat = jnp.transpose(
        jnp.asarray(x_bti, jnp.float32), (1, 0, 2)).reshape(T * B, I)

    args = [x_flat]
    for layer in layers:
        args += [
            jnp.asarray(layer["w_ih"].T, jnp.float32),                   # (in_l, 4H)
            jnp.asarray(layer["w_hh"].T, jnp.float32),                   # (H, 4H)
            (layer["b_ih"] + layer["b_hh"]).reshape(1, 4 * H).astype(jnp.float32),
        ]

    # Lane-dense classifier: pad O -> 128 with zero columns/entries (free: a
    # (T*H, 8) f32 operand would be lane-padded to 128 in VMEM anyway).
    w_out_p = jnp.zeros((T * H, O_PAD), jnp.float32).at[:, :O].set(
        jnp.asarray(params["w_out"].T, jnp.float32))
    b_out_p = jnp.zeros((1, O_PAD), jnp.float32).at[0, :O].set(
        jnp.asarray(params["b_out"], jnp.float32))
    args += [w_out_p, b_out_p]

    vmem = pltpu.MemorySpace.VMEM
    out_p = pl.pallas_call(
        _make_fused_kernel(L, T, H, B),
        out_shape=jax.ShapeDtypeStruct((B, O_PAD), jnp.float32),
        in_specs=[pl.BlockSpec(memory_space=vmem)] * len(args),
        out_specs=pl.BlockSpec(memory_space=vmem),
    )(*args)
    return out_p[:, :O]


# ----------------------------------------------------------------------------
# Pure-JAX reference (lax.scan LSTM) for correctness checking.
# ----------------------------------------------------------------------------
def forward_ref(params, x_bti):
    B, T, I = x_bti.shape

    def one_layer(x_tbi, layer):
        H = layer["w_hh"].shape[1]
        b = layer["b_ih"] + layer["b_hh"]

        def step(carry, x_t):
            h, c = carry
            gates = x_t @ layer["w_ih"].T + h @ layer["w_hh"].T + b
            i_g = jax.nn.sigmoid(gates[:, 0 * H:1 * H])
            f_g = jax.nn.sigmoid(gates[:, 1 * H:2 * H])
            g_g = jnp.tanh(gates[:, 2 * H:3 * H])
            o_g = jax.nn.sigmoid(gates[:, 3 * H:4 * H])
            c_new = f_g * c + i_g * g_g
            h_new = o_g * jnp.tanh(c_new)
            return (h_new, c_new), h_new

        init = (jnp.zeros((B, H), jnp.float32), jnp.zeros((B, H), jnp.float32))
        _, hseq = jax.lax.scan(step, init, x_tbi)
        return hseq

    x = jnp.transpose(x_bti, (1, 0, 2))
    for layer in params["lstm"]:
        x = one_layer(x, layer)
    lstm_out = jnp.transpose(x, (1, 0, 2)).reshape(B, -1)
    return lstm_out @ params["w_out"].T + params["b_out"]


# ----------------------------------------------------------------------------
# Deterministic parameter init (mirrors PyTorch uniform(-1/sqrt(H), 1/sqrt(H))).
# ----------------------------------------------------------------------------
def init_params(key, input_dim, hidden_dim, num_layers, time_dim, target_size):
    params = {"lstm": []}
    k = 1.0 / jnp.sqrt(hidden_dim)
    in_dim = input_dim
    for _ in range(num_layers):
        key, k1, k2, k3, k4 = jax.random.split(key, 5)
        params["lstm"].append({
            "w_ih": jax.random.uniform(k1, (4 * hidden_dim, in_dim),
                                       jnp.float32, -k, k),
            "w_hh": jax.random.uniform(k2, (4 * hidden_dim, hidden_dim),
                                       jnp.float32, -k, k),
            "b_ih": jax.random.uniform(k3, (4 * hidden_dim,),
                                       jnp.float32, -k, k),
            "b_hh": jax.random.uniform(k4, (4 * hidden_dim,),
                                       jnp.float32, -k, k),
        })
        in_dim = hidden_dim
    fan_in = hidden_dim * time_dim  # directions = 1
    kl = 1.0 / jnp.sqrt(fan_in)
    key, k1, k2 = jax.random.split(key, 3)
    params["w_out"] = jax.random.uniform(k1, (target_size, fan_in),
                                         jnp.float32, -kl, kl)
    params["b_out"] = jax.random.uniform(k2, (target_size,),
                                         jnp.float32, -kl, kl)
    return params


if __name__ == "__main__":
    # hidden_dim=32, input_dim=16, num_layers=2, batch_first=True,
    # target_size=8, minibatch_size=2, time_dim=8, bidirectional=False
    B, T, I, H, L, O = 2, 8, 16, 32, 2, 8

    key = jax.random.PRNGKey(0)
    key, pkey, xkey = jax.random.split(key, 3)
    params = init_params(pkey, I, H, L, T, O)
    x = jax.random.normal(xkey, (B, T, I), jnp.float32)  # batch_first input

    out = jax.block_until_ready(forward_pallas(params, x))
    ref = jax.block_until_ready(forward_ref(params, x))

    assert out.shape == (B, O), out.shape
    assert jnp.allclose(out, ref, rtol=1e-4, atol=1e-4), (
        "mismatch", float(jnp.max(jnp.abs(out - ref))))
    print("KERNEL_OK")
</pallas_src>

<mosaic_0001>
module attributes {stable_mosaic.version = 11 : i64} {
  func.func @kernel(%arg0: memref<16x16xf32, #tpu.memory_space<vmem>>, %arg1: memref<16x128xf32, #tpu.memory_space<vmem>>, %arg2: memref<32x128xf32, #tpu.memory_space<vmem>>, %arg3: memref<1x128xf32, #tpu.memory_space<vmem>>, %arg4: memref<32x128xf32, #tpu.memory_space<vmem>>, %arg5: memref<32x128xf32, #tpu.memory_space<vmem>>, %arg6: memref<1x128xf32, #tpu.memory_space<vmem>>, %arg7: memref<256x128xf32, #tpu.memory_space<vmem>>, %arg8: memref<1x128xf32, #tpu.memory_space<vmem>>, %arg9: memref<2x128xf32, #tpu.memory_space<vmem>>) attributes {dimension_semantics = [], scalar_prefetch = 0 : i64, scratch_operands = 0 : i64, tpu.core_type = #tpu.core_type<tc>} {
    %0 = tpu.iota {dimensions = array<i32: 1>} : vector<2x128xi32>
    %c64_i32 = arith.constant 64 : i32
    %1 = vector.broadcast %c64_i32 : i32 to vector<2x128xi32>
    %2 = arith.cmpi sge, %0, %1 : vector<2x128xi32>
    %c96_i32 = arith.constant 96 : i32
    %3 = vector.broadcast %c96_i32 : i32 to vector<2x128xi32>
    %4 = arith.cmpi slt, %0, %3 : vector<2x128xi32>
    %5 = arith.andi %2, %4 : vector<2x128xi1>
    %cst = arith.constant 0.000000e+00 : f32
    %6 = vector.broadcast %cst : f32 to vector<2x128xf32>
    %c0 = arith.constant 0 : index
    %c0_0 = arith.constant 0 : index
    %7 = vector.load %arg0[%c0, %c0_0] : memref<16x16xf32, #tpu.memory_space<vmem>>, vector<16x16xf32>
    %c0_1 = arith.constant 0 : index
    %c0_2 = arith.constant 0 : index
    %8 = vector.load %arg1[%c0_1, %c0_2] : memref<16x128xf32, #tpu.memory_space<vmem>>, vector<16x128xf32>
    %c0_3 = arith.constant 0 : index
    %c0_4 = arith.constant 0 : index
    %9 = vector.load %arg2[%c0_3, %c0_4] : memref<32x128xf32, #tpu.memory_space<vmem>>, vector<32x128xf32>
    %c0_5 = arith.constant 0 : index
    %c0_6 = arith.constant 0 : index
    %10 = vector.load %arg3[%c0_5, %c0_6] : memref<1x128xf32, #tpu.memory_space<vmem>>, vector<1x128xf32>
    %cst_7 = arith.constant dense<0.000000e+00> : vector<16x128xf32>
    %11 = tpu.matmul %7, %8, %cst_7 {dimension_numbers = #tpu.dot_dimension_numbers<[1], [0], [0], [1], [0, 0, 1, 1], [], []>} : vector<16x16xf32>, vector<16x128xf32>, vector<16x128xf32> -> vector<16x128xf32>
    %12 = vector.broadcast %10 : vector<1x128xf32> to vector<16x128xf32>
    %13 = arith.addf %11, %12 : vector<16x128xf32>
    %14 = vector.extract_strided_slice %13 {offsets = [0, 0], sizes = [2, 128], strides = [1, 1]} : vector<16x128xf32> to vector<2x128xf32>
    %15 = vector.extract_strided_slice %13 {offsets = [2, 0], sizes = [2, 128], strides = [1, 1]} : vector<16x128xf32> to vector<2x128xf32>
    %16 = vector.extract_strided_slice %13 {offsets = [4, 0], sizes = [2, 128], strides = [1, 1]} : vector<16x128xf32> to vector<2x128xf32>
    %17 = vector.extract_strided_slice %13 {offsets = [6, 0], sizes = [2, 128], strides = [1, 1]} : vector<16x128xf32> to vector<2x128xf32>
    %18 = vector.extract_strided_slice %13 {offsets = [8, 0], sizes = [2, 128], strides = [1, 1]} : vector<16x128xf32> to vector<2x128xf32>
    %19 = vector.extract_strided_slice %13 {offsets = [10, 0], sizes = [2, 128], strides = [1, 1]} : vector<16x128xf32> to vector<2x128xf32>
    %20 = vector.extract_strided_slice %13 {offsets = [12, 0], sizes = [2, 128], strides = [1, 1]} : vector<16x128xf32> to vector<2x128xf32>
    %21 = vector.extract_strided_slice %13 {offsets = [14, 0], sizes = [2, 128], strides = [1, 1]} : vector<16x128xf32> to vector<2x128xf32>
    %cst_8 = arith.constant 0.000000e+00 : f32
    %22 = vector.broadcast %cst_8 : f32 to vector<2x32xf32>
    %cst_9 = arith.constant 0.000000e+00 : f32
    %23 = vector.broadcast %cst_9 : f32 to vector<2x32xf32>
    %cst_10 = arith.constant dense<0.000000e+00> : vector<2x128xf32>
    %24 = tpu.matmul %22, %9, %cst_10 {dimension_numbers = #tpu.dot_dimension_numbers<[1], [0], [0], [1], [0, 0, 1, 1], [], []>} : vector<2x32xf32>, vector<32x128xf32>, vector<2x128xf32> -> vector<2x128xf32>
    %25 = arith.addf %14, %24 : vector<2x128xf32>
    %26 = math.tanh %25 : vector<2x128xf32>
    %27 = arith.negf %25 : vector<2x128xf32>
    %28 = math.exp %27 : vector<2x128xf32>
    %cst_11 = arith.constant 1.000000e+00 : f32
    %29 = vector.broadcast %cst_11 : f32 to vector<2x128xf32>
    %30 = arith.addf %29, %28 : vector<2x128xf32>
    %31 = arith.divf %29, %30 : vector<2x128xf32>
    %32 = arith.select %5, %26, %31 : vector<2x128xi1>, vector<2x128xf32>
    %33 = vector.extract_strided_slice %32 {offsets = [0, 0], sizes = [2, 32], strides = [1, 1]} : vector<2x128xf32> to vector<2x32xf32>
    %34 = vector.extract_strided_slice %32 {offsets = [0, 32], sizes = [2, 32], strides = [1, 1]} : vector<2x128xf32> to vector<2x32xf32>
    %35 = vector.extract_strided_slice %32 {offsets = [0, 64], sizes = [2, 32], strides = [1, 1]} : vector<2x128xf32> to vector<2x32xf32>
    %36 = vector.extract_strided_slice %32 {offsets = [0, 96], sizes = [2, 32], strides = [1, 1]} : vector<2x128xf32> to vector<2x32xf32>
    %37 = arith.mulf %34, %23 : vector<2x32xf32>
    %38 = arith.mulf %33, %35 : vector<2x32xf32>
    %39 = arith.addf %37, %38 : vector<2x32xf32>
    %40 = math.tanh %39 : vector<2x32xf32>
    %41 = arith.mulf %36, %40 : vector<2x32xf32>
    %cst_12 = arith.constant dense<0.000000e+00> : vector<2x128xf32>
    %42 = tpu.matmul %41, %9, %cst_12 {dimension_numbers = #tpu.dot_dimension_numbers<[1], [0], [0], [1], [0, 0, 1, 1], [], []>} : vector<2x32xf32>, vector<32x128xf32>, vector<2x128xf32> -> vector<2x128xf32>
    %43 = arith.addf %15, %42 : vector<2x128xf32>
    %44 = math.tanh %43 : vector<2x128xf32>
    %45 = arith.negf %43 : vector<2x128xf32>
    %46 = math.exp %45 : vector<2x128xf32>
    %cst_13 = arith.constant 1.000000e+00 : f32
    %47 = vector.broadcast %cst_13 : f32 to vector<2x128xf32>
    %48 = arith.addf %47, %46 : vector<2x128xf32>
    %49 = arith.divf %47, %48 : vector<2x128xf32>
    %50 = arith.select %5, %44, %49 : vector<2x128xi1>, vector<2x128xf32>
    %51 = vector.extract_strided_slice %50 {offsets = [0, 0], sizes = [2, 32], strides = [1, 1]} : vector<2x128xf32> to vector<2x32xf32>
    %52 = vector.extract_strided_slice %50 {offsets = [0, 32], sizes = [2, 32], strides = [1, 1]} : vector<2x128xf32> to vector<2x32xf32>
    %53 = vector.extract_strided_slice %50 {offsets = [0, 64], sizes = [2, 32], strides = [1, 1]} : vector<2x128xf32> to vector<2x32xf32>
    %54 = vector.extract_strided_slice %50 {offsets = [0, 96], sizes = [2, 32], strides = [1, 1]} : vector<2x128xf32> to vector<2x32xf32>
    %55 = arith.mulf %52, %39 : vector<2x32xf32>
    %56 = arith.mulf %51, %53 : vector<2x32xf32>
    %57 = arith.addf %55, %56 : vector<2x32xf32>
    %58 = math.tanh %57 : vector<2x32xf32>
    %59 = arith.mulf %54, %58 : vector<2x32xf32>
    %cst_14 = arith.constant dense<0.000000e+00> : vector<2x128xf32>
    %60 = tpu.matmul %59, %9, %cst_14 {dimension_numbers = #tpu.dot_dimension_numbers<[1], [0], [0], [1], [0, 0, 1, 1], [], []>} : vector<2x32xf32>, vector<32x128xf32>, vector<2x128xf32> -> vector<2x128xf32>
    %61 = arith.addf %16, %60 : vector<2x128xf32>
    %62 = math.tanh %61 : vector<2x128xf32>
    %63 = arith.negf %61 : vector<2x128xf32>
    %64 = math.exp %63 : vector<2x128xf32>
    %cst_15 = arith.constant 1.000000e+00 : f32
    %65 = vector.broadcast %cst_15 : f32 to vector<2x128xf32>
    %66 = arith.addf %65, %64 : vector<2x128xf32>
    %67 = arith.divf %65, %66 : vector<2x128xf32>
    %68 = arith.select %5, %62, %67 : vector<2x128xi1>, vector<2x128xf32>
    %69 = vector.extract_strided_slice %68 {offsets = [0, 0], sizes = [2, 32], strides = [1, 1]} : vector<2x128xf32> to vector<2x32xf32>
    %70 = vector.extract_strided_slice %68 {offsets = [0, 32], sizes = [2, 32], strides = [1, 1]} : vector<2x128xf32> to vector<2x32xf32>
    %71 = vector.extract_strided_slice %68 {offsets = [0, 64], sizes = [2, 32], strides = [1, 1]} : vector<2x128xf32> to vector<2x32xf32>
    %72 = vector.extract_strided_slice %68 {offsets = [0, 96], sizes = [2, 32], strides = [1, 1]} : vector<2x128xf32> to vector<2x32xf32>
    %73 = arith.mulf %70, %57 : vector<2x32xf32>
    %74 = arith.mulf %69, %71 : vector<2x32xf32>
    %75 = arith.addf %73, %74 : vector<2x32xf32>
    %76 = math.tanh %75 : vector<2x32xf32>
    %77 = arith.mulf %72, %76 : vector<2x32xf32>
    %cst_16 = arith.constant dense<0.000000e+00> : vector<2x128xf32>
    %78 = tpu.matmul %77, %9, %cst_16 {dimension_numbers = #tpu.dot_dimension_numbers<[1], [0], [0], [1], [0, 0, 1, 1], [], []>} : vector<2x32xf32>, vector<32x128xf32>, vector<2x128xf32> -> vector<2x128xf32>
    %79 = arith.addf %17, %78 : vector<2x128xf32>
    %80 = math.tanh %79 : vector<2x128xf32>
    %81 = arith.negf %79 : vector<2x128xf32>
    %82 = math.exp %81 : vector<2x128xf32>
    %cst_17 = arith.constant 1.000000e+00 : f32
    %83 = vector.broadcast %cst_17 : f32 to vector<2x128xf32>
    %84 = arith.addf %83, %82 : vector<2x128xf32>
    %85 = arith.divf %83, %84 : vector<2x128xf32>
    %86 = arith.select %5, %80, %85 : vector<2x128xi1>, vector<2x128xf32>
    %87 = vector.extract_strided_slice %86 {offsets = [0, 0], sizes = [2, 32], strides = [1, 1]} : vector<2x128xf32> to vector<2x32xf32>
    %88 = vector.extract_strided_slice %86 {offsets = [0, 32], sizes = [2, 32], strides = [1, 1]} : vector<2x128xf32> to vector<2x32xf32>
    %89 = vector.extract_strided_slice %86 {offsets = [0, 64], sizes = [2, 32], strides = [1, 1]} : vector<2x128xf32> to vector<2x32xf32>
    %90 = vector.extract_strided_slice %86 {offsets = [0, 96], sizes = [2, 32], strides = [1, 1]} : vector<2x128xf32> to vector<2x32xf32>
    %91 = arith.mulf %88, %75 : vector<2x32xf32>
    %92 = arith.mulf %87, %89 : vector<2x32xf32>
    %93 = arith.addf %91, %92 : vector<2x32xf32>
    %94 = math.tanh %93 : vector<2x32xf32>
    %95 = arith.mulf %90, %94 : vector<2x32xf32>
    %cst_18 = arith.constant dense<0.000000e+00> : vector<2x128xf32>
    %96 = tpu.matmul %95, %9, %cst_18 {dimension_numbers = #tpu.dot_dimension_numbers<[1], [0], [0], [1], [0, 0, 1, 1], [], []>} : vector<2x32xf32>, vector<32x128xf32>, vector<2x128xf32> -> vector<2x128xf32>
    %97 = arith.addf %18, %96 : vector<2x128xf32>
    %98 = math.tanh %97 : vector<2x128xf32>
    %99 = arith.negf %97 : vector<2x128xf32>
    %100 = math.exp %99 : vector<2x128xf32>
    %cst_19 = arith.constant 1.000000e+00 : f32
    %101 = vector.broadcast %cst_19 : f32 to vector<2x128xf32>
    %102 = arith.addf %101, %100 : vector<2x128xf32>
    %103 = arith.divf %101, %102 : vector<2x128xf32>
    %104 = arith.select %5, %98, %103 : vector<2x128xi1>, vector<2x128xf32>
    %105 = vector.extract_strided_slice %104 {offsets = [0, 0], sizes = [2, 32], strides = [1, 1]} : vector<2x128xf32> to vector<2x32xf32>
    %106 = vector.extract_strided_slice %104 {offsets = [0, 32], sizes = [2, 32], strides = [1, 1]} : vector<2x128xf32> to vector<2x32xf32>
    %107 = vector.extract_strided_slice %104 {offsets = [0, 64], sizes = [2, 32], strides = [1, 1]} : vector<2x128xf32> to vector<2x32xf32>
    %108 = vector.extract_strided_slice %104 {offsets = [0, 96], sizes = [2, 32], strides = [1, 1]} : vector<2x128xf32> to vector<2x32xf32>
    %109 = arith.mulf %106, %93 : vector<2x32xf32>
    %110 = arith.mulf %105, %107 : vector<2x32xf32>
    %111 = arith.addf %109, %110 : vector<2x32xf32>
    %112 = math.tanh %111 : vector<2x32xf32>
    %113 = arith.mulf %108, %112 : vector<2x32xf32>
    %cst_20 = arith.constant dense<0.000000e+00> : vector<2x128xf32>
    %114 = tpu.matmul %113, %9, %cst_20 {dimension_numbers = #tpu.dot_dimension_numbers<[1], [0], [0], [1], [0, 0, 1, 1], [], []>} : vector<2x32xf32>, vector<32x128xf32>, vector<2x128xf32> -> vector<2x128xf32>
    %115 = arith.addf %19, %114 : vector<2x128xf32>
    %116 = math.tanh %115 : vector<2x128xf32>
    %117 = arith.negf %115 : vector<2x128xf32>
    %118 = math.exp %117 : vector<2x128xf32>
    %cst_21 = arith.constant 1.000000e+00 : f32
    %119 = vector.broadcast %cst_21 : f32 to vector<2x128xf32>
    %120 = arith.addf %119, %118 : vector<2x128xf32>
    %121 = arith.divf %119, %120 : vector<2x128xf32>
    %122 = arith.select %5, %116, %121 : vector<2x128xi1>, vector<2x128xf32>
    %123 = vector.extract_strided_slice %122 {offsets = [0, 0], sizes = [2, 32], strides = [1, 1]} : vector<2x128xf32> to vector<2x32xf32>
    %124 = vector.extract_strided_slice %122 {offsets = [0, 32], sizes = [2, 32], strides = [1, 1]} : vector<2x128xf32> to vector<2x32xf32>
    %125 = vector.extract_strided_slice %122 {offsets = [0, 64], sizes = [2, 32], strides = [1, 1]} : vector<2x128xf32> to vector<2x32xf32>
    %126 = vector.extract_strided_slice %122 {offsets = [0, 96], sizes = [2, 32], strides = [1, 1]} : vector<2x128xf32> to vector<2x32xf32>
    %127 = arith.mulf %124, %111 : vector<2x32xf32>
    %128 = arith.mulf %123, %125 : vector<2x32xf32>
    %129 = arith.addf %127, %128 : vector<2x32xf32>
    %130 = math.tanh %129 : vector<2x32xf32>
    %131 = arith.mulf %126, %130 : vector<2x32xf32>
    %cst_22 = arith.constant dense<0.000000e+00> : vector<2x128xf32>
    %132 = tpu.matmul %131, %9, %cst_22 {dimension_numbers = #tpu.dot_dimension_numbers<[1], [0], [0], [1], [0, 0, 1, 1], [], []>} : vector<2x32xf32>, vector<32x128xf32>, vector<2x128xf32> -> vector<2x128xf32>
    %133 = arith.addf %20, %132 : vector<2x128xf32>
    %134 = math.tanh %133 : vector<2x128xf32>
    %135 = arith.negf %133 : vector<2x128xf32>
    %136 = math.exp %135 : vector<2x128xf32>
    %cst_23 = arith.constant 1.000000e+00 : f32
    %137 = vector.broadcast %cst_23 : f32 to vector<2x128xf32>
    %138 = arith.addf %137, %136 : vector<2x128xf32>
    %139 = arith.divf %137, %138 : vector<2x128xf32>
    %140 = arith.select %5, %134, %139 : vector<2x128xi1>, vector<2x128xf32>
    %141 = vector.extract_strided_slice %140 {offsets = [0, 0], sizes = [2, 32], strides = [1, 1]} : vector<2x128xf32> to vector<2x32xf32>
    %142 = vector.extract_strided_slice %140 {offsets = [0, 32], sizes = [2, 32], strides = [1, 1]} : vector<2x128xf32> to vector<2x32xf32>
    %143 = vector.extract_strided_slice %140 {offsets = [0, 64], sizes = [2, 32], strides = [1, 1]} : vector<2x128xf32> to vector<2x32xf32>
    %144 = vector.extract_strided_slice %140 {offsets = [0, 96], sizes = [2, 32], strides = [1, 1]} : vector<2x128xf32> to vector<2x32xf32>
    %145 = arith.mulf %142, %129 : vector<2x32xf32>
    %146 = arith.mulf %141, %143 : vector<2x32xf32>
    %147 = arith.addf %145, %146 : vector<2x32xf32>
    %148 = math.tanh %147 : vector<2x32xf32>
    %149 = arith.mulf %144, %148 : vector<2x32xf32>
    %cst_24 = arith.constant dense<0.000000e+00> : vector<2x128xf32>
    %150 = tpu.matmul %149, %9, %cst_24 {dimension_numbers = #tpu.dot_dimension_numbers<[1], [0], [0], [1], [0, 0, 1, 1], [], []>} : vector<2x32xf32>, vector<32x128xf32>, vector<2x128xf32> -> vector<2x128xf32>
    %151 = arith.addf %21, %150 : vector<2x128xf32>
    %152 = math.tanh %151 : vector<2x128xf32>
    %153 = arith.negf %151 : vector<2x128xf32>
    %154 = math.exp %153 : vector<2x128xf32>
    %cst_25 = arith.constant 1.000000e+00 : f32
    %155 = vector.broadcast %cst_25 : f32 to vector<2x128xf32>
    %156 = arith.addf %155, %154 : vector<2x128xf32>
    %157 = arith.divf %155, %156 : vector<2x128xf32>
    %158 = arith.select %5, %152, %157 : vector<2x128xi1>, vector<2x128xf32>
    %159 = vector.extract_strided_slice %158 {offsets = [0, 0], sizes = [2, 32], strides = [1, 1]} : vector<2x128xf32> to vector<2x32xf32>
    %160 = vector.extract_strided_slice %158 {offsets = [0, 32], sizes = [2, 32], strides = [1, 1]} : vector<2x128xf32> to vector<2x32xf32>
    %161 = vector.extract_strided_slice %158 {offsets = [0, 64], sizes = [2, 32], strides = [1, 1]} : vector<2x128xf32> to vector<2x32xf32>
    %162 = vector.extract_strided_slice %158 {offsets = [0, 96], sizes = [2, 32], strides = [1, 1]} : vector<2x128xf32> to vector<2x32xf32>
    %163 = arith.mulf %160, %147 : vector<2x32xf32>
    %164 = arith.mulf %159, %161 : vector<2x32xf32>
    %165 = arith.addf %163, %164 : vector<2x32xf32>
    %166 = math.tanh %165 : vector<2x32xf32>
    %167 = arith.mulf %162, %166 : vector<2x32xf32>
    %168 = tpu.concatenate %41, %59, %77, %95, %113, %131, %149, %167 in 0 : vector<2x32xf32>, vector<2x32xf32>, vector<2x32xf32>, vector<2x32xf32>, vector<2x32xf32>, vector<2x32xf32>, vector<2x32xf32>, vector<2x32xf32> -> vector<16x32xf32>
    %c0_26 = arith.constant 0 : index
    %c0_27 = arith.constant 0 : index
    %169 = vector.load %arg4[%c0_26, %c0_27] : memref<32x128xf32, #tpu.memory_space<vmem>>, vector<32x128xf32>
    %c0_28 = arith.constant 0 : index
    %c0_29 = arith.constant 0 : index
    %170 = vector.load %arg5[%c0_28, %c0_29] : memref<32x128xf32, #tpu.memory_space<vmem>>, vector<32x128xf32>
    %c0_30 = arith.constant 0 : index
    %c0_31 = arith.constant 0 : index
    %171 = vector.load %arg6[%c0_30, %c0_31] : memref<1x128xf32, #tpu.memory_space<vmem>>, vector<1x128xf32>
    %cst_32 = arith.constant dense<0.000000e+00> : vector<16x128xf32>
    %172 = tpu.matmul %168, %169, %cst_32 {dimension_numbers = #tpu.dot_dimension_numbers<[1], [0], [0], [1], [0, 0, 1, 1], [], []>} : vector<16x32xf32>, vector<32x128xf32>, vector<16x128xf32> -> vector<16x128xf32>
    %173 = vector.broadcast %171 : vector<1x128xf32> to vector<16x128xf32>
    %174 = arith.addf %172, %173 : vector<16x128xf32>
    %175 = vector.extract_strided_slice %174 {offsets = [0, 0], sizes = [2, 128], strides = [1, 1]} : vector<16x128xf32> to vector<2x128xf32>
    %176 = vector.extract_strided_slice %174 {offsets = [2, 0], sizes = [2, 128], strides = [1, 1]} : vector<16x128xf32> to vector<2x128xf32>
    %177 = vector.extract_strided_slice %174 {offsets = [4, 0], sizes = [2, 128], strides = [1, 1]} : vector<16x128xf32> to vector<2x128xf32>
    %178 = vector.extract_strided_slice %174 {offsets = [6, 0], sizes = [2, 128], strides = [1, 1]} : vector<16x128xf32> to vector<2x128xf32>
    %179 = vector.extract_strided_slice %174 {offsets = [8, 0], sizes = [2, 128], strides = [1, 1]} : vector<16x128xf32> to vector<2x128xf32>
    %180 = vector.extract_strided_slice %174 {offsets = [10, 0], sizes = [2, 128], strides = [1, 1]} : vector<16x128xf32> to vector<2x128xf32>
    %181 = vector.extract_strided_slice %174 {offsets = [12, 0], sizes = [2, 128], strides = [1, 1]} : vector<16x128xf32> to vector<2x128xf32>
    %182 = vector.extract_strided_slice %174 {offsets = [14, 0], sizes = [2, 128], strides = [1, 1]} : vector<16x128xf32> to vector<2x128xf32>
    %cst_33 = arith.constant 0.000000e+00 : f32
    %183 = vector.broadcast %cst_33 : f32 to vector<2x32xf32>
    %cst_34 = arith.constant 0.000000e+00 : f32
    %184 = vector.broadcast %cst_34 : f32 to vector<2x32xf32>
    %cst_35 = arith.constant dense<0.000000e+00> : vector<2x128xf32>
    %185 = tpu.matmul %183, %170, %cst_35 {dimension_numbers = #tpu.dot_dimension_numbers<[1], [0], [0], [1], [0, 0, 1, 1], [], []>} : vector<2x32xf32>, vector<32x128xf32>, vector<2x128xf32> -> vector<2x128xf32>
    %186 = arith.addf %175, %185 : vector<2x128xf32>
    %187 = math.tanh %186 : vector<2x128xf32>
    %188 = arith.negf %186 : vector<2x128xf32>
    %189 = math.exp %188 : vector<2x128xf32>
    %cst_36 = arith.constant 1.000000e+00 : f32
    %190 = vector.broadcast %cst_36 : f32 to vector<2x128xf32>
    %191 = arith.addf %190, %189 : vector<2x128xf32>
    %192 = arith.divf %190, %191 : vector<2x128xf32>
    %193 = arith.select %5, %187, %192 : vector<2x128xi1>, vector<2x128xf32>
    %194 = vector.extract_strided_slice %193 {offsets = [0, 0], sizes = [2, 32], strides = [1, 1]} : vector<2x128xf32> to vector<2x32xf32>
    %195 = vector.extract_strided_slice %193 {offsets = [0, 32], sizes = [2, 32], strides = [1, 1]} : vector<2x128xf32> to vector<2x32xf32>
    %196 = vector.extract_strided_slice %193 {offsets = [0, 64], sizes = [2, 32], strides = [1, 1]} : vector<2x128xf32> to vector<2x32xf32>
    %197 = vector.extract_strided_slice %193 {offsets = [0, 96], sizes = [2, 32], strides = [1, 1]} : vector<2x128xf32> to vector<2x32xf32>
    %198 = arith.mulf %195, %184 : vector<2x32xf32>
    %199 = arith.mulf %194, %196 : vector<2x32xf32>
    %200 = arith.addf %198, %199 : vector<2x32xf32>
    %201 = math.tanh %200 : vector<2x32xf32>
    %202 = arith.mulf %197, %201 : vector<2x32xf32>
    %c0_37 = arith.constant 0 : index
    %c0_38 = arith.constant 0 : index
    %203 = vector.load %arg7[%c0_37, %c0_38] : memref<256x128xf32, #tpu.memory_space<vmem>>, vector<32x128xf32>
    %cst_39 = arith.constant dense<0.000000e+00> : vector<2x128xf32>
    %204 = tpu.matmul %202, %203, %cst_39 {dimension_numbers = #tpu.dot_dimension_numbers<[1], [0], [0], [1], [0, 0, 1, 1], [], []>} : vector<2x32xf32>, vector<32x128xf32>, vector<2x128xf32> -> vector<2x128xf32>
    %205 = arith.addf %6, %204 : vector<2x128xf32>
    %cst_40 = arith.constant dense<0.000000e+00> : vector<2x128xf32>
    %206 = tpu.matmul %202, %170, %cst_40 {dimension_numbers = #tpu.dot_dimension_numbers<[1], [0], [0], [1], [0, 0, 1, 1], [], []>} : vector<2x32xf32>, vector<32x128xf32>, vector<2x128xf32> -> vector<2x128xf32>
    %207 = arith.addf %176, %206 : vector<2x128xf32>
    %208 = math.tanh %207 : vector<2x128xf32>
    %209 = arith.negf %207 : vector<2x128xf32>
    %210 = math.exp %209 : vector<2x128xf32>
    %cst_41 = arith.constant 1.000000e+00 : f32
    %211 = vector.broadcast %cst_41 : f32 to vector<2x128xf32>
    %212 = arith.addf %211, %210 : vector<2x128xf32>
    %213 = arith.divf %211, %212 : vector<2x128xf32>
    %214 = arith.select %5, %208, %213 : vector<2x128xi1>, vector<2x128xf32>
    %215 = vector.extract_strided_slice %214 {offsets = [0, 0], sizes = [2, 32], strides = [1, 1]} : vector<2x128xf32> to vector<2x32xf32>
    %216 = vector.extract_strided_slice %214 {offsets = [0, 32], sizes = [2, 32], strides = [1, 1]} : vector<2x128xf32> to vector<2x32xf32>
    %217 = vector.extract_strided_slice %214 {offsets = [0, 64], sizes = [2, 32], strides = [1, 1]} : vector<2x128xf32> to vector<2x32xf32>
    %218 = vector.extract_strided_slice %214 {offsets = [0, 96], sizes = [2, 32], strides = [1, 1]} : vector<2x128xf32> to vector<2x32xf32>
    %219 = arith.mulf %216, %200 : vector<2x32xf32>
    %220 = arith.mulf %215, %217 : vector<2x32xf32>
    %221 = arith.addf %219, %220 : vector<2x32xf32>
    %222 = math.tanh %221 : vector<2x32xf32>
    %223 = arith.mulf %218, %222 : vector<2x32xf32>
    %c32 = arith.constant 32 : index
    %c0_42 = arith.constant 0 : index
    %224 = vector.load %arg7[%c32, %c0_42] : memref<256x128xf32, #tpu.memory_space<vmem>>, vector<32x128xf32>
    %cst_43 = arith.constant dense<0.000000e+00> : vector<2x128xf32>
    %225 = tpu.matmul %223, %224, %cst_43 {dimension_numbers = #tpu.dot_dimension_numbers<[1], [0], [0], [1], [0, 0, 1, 1], [], []>} : vector<2x32xf32>, vector<32x128xf32>, vector<2x128xf32> -> vector<2x128xf32>
    %226 = arith.addf %205, %225 : vector<2x128xf32>
    %cst_44 = arith.constant dense<0.000000e+00> : vector<2x128xf32>
    %227 = tpu.matmul %223, %170, %cst_44 {dimension_numbers = #tpu.dot_dimension_numbers<[1], [0], [0], [1], [0, 0, 1, 1], [], []>} : vector<2x32xf32>, vector<32x128xf32>, vector<2x128xf32> -> vector<2x128xf32>
    %228 = arith.addf %177, %227 : vector<2x128xf32>
    %229 = math.tanh %228 : vector<2x128xf32>
    %230 = arith.negf %228 : vector<2x128xf32>
    %231 = math.exp %230 : vector<2x128xf32>
    %cst_45 = arith.constant 1.000000e+00 : f32
    %232 = vector.broadcast %cst_45 : f32 to vector<2x128xf32>
    %233 = arith.addf %232, %231 : vector<2x128xf32>
    %234 = arith.divf %232, %233 : vector<2x128xf32>
    %235 = arith.select %5, %229, %234 : vector<2x128xi1>, vector<2x128xf32>
    %236 = vector.extract_strided_slice %235 {offsets = [0, 0], sizes = [2, 32], strides = [1, 1]} : vector<2x128xf32> to vector<2x32xf32>
    %237 = vector.extract_strided_slice %235 {offsets = [0, 32], sizes = [2, 32], strides = [1, 1]} : vector<2x128xf32> to vector<2x32xf32>
    %238 = vector.extract_strided_slice %235 {offsets = [0, 64], sizes = [2, 32], strides = [1, 1]} : vector<2x128xf32> to vector<2x32xf32>
    %239 = vector.extract_strided_slice %235 {offsets = [0, 96], sizes = [2, 32], strides = [1, 1]} : vector<2x128xf32> to vector<2x32xf32>
    %240 = arith.mulf %237, %221 : vector<2x32xf32>
    %241 = arith.mulf %236, %238 : vector<2x32xf32>
    %242 = arith.addf %240, %241 : vector<2x32xf32>
    %243 = math.tanh %242 : vector<2x32xf32>
    %244 = arith.mulf %239, %243 : vector<2x32xf32>
    %c64 = arith.constant 64 : index
    %c0_46 = arith.constant 0 : index
    %245 = vector.load %arg7[%c64, %c0_46] : memref<256x128xf32, #tpu.memory_space<vmem>>, vector<32x128xf32>
    %cst_47 = arith.constant dense<0.000000e+00> : vector<2x128xf32>
    %246 = tpu.matmul %244, %245, %cst_47 {dimension_numbers = #tpu.dot_dimension_numbers<[1], [0], [0], [1], [0, 0, 1, 1], [], []>} : vector<2x32xf32>, vector<32x128xf32>, vector<2x128xf32> -> vector<2x128xf32>
    %247 = arith.addf %226, %246 : vector<2x128xf32>
    %cst_48 = arith.constant dense<0.000000e+00> : vector<2x128xf32>
    %248 = tpu.matmul %244, %170, %cst_48 {dimension_numbers = #tpu.dot_dimension_numbers<[1], [0], [0], [1], [0, 0, 1, 1], [], []>} : vector<2x32xf32>, vector<32x128xf32>, vector<2x128xf32> -> vector<2x128xf32>
    %249 = arith.addf %178, %248 : vector<2x128xf32>
    %250 = math.tanh %249 : vector<2x128xf32>
    %251 = arith.negf %249 : vector<2x128xf32>
    %252 = math.exp %251 : vector<2x128xf32>
    %cst_49 = arith.constant 1.000000e+00 : f32
    %253 = vector.broadcast %cst_49 : f32 to vector<2x128xf32>
    %254 = arith.addf %253, %252 : vector<2x128xf32>
    %255 = arith.divf %253, %254 : vector<2x128xf32>
    %256 = arith.select %5, %250, %255 : vector<2x128xi1>, vector<2x128xf32>
    %257 = vector.extract_strided_slice %256 {offsets = [0, 0], sizes = [2, 32], strides = [1, 1]} : vector<2x128xf32> to vector<2x32xf32>
    %258 = vector.extract_strided_slice %256 {offsets = [0, 32], sizes = [2, 32], strides = [1, 1]} : vector<2x128xf32> to vector<2x32xf32>
    %259 = vector.extract_strided_slice %256 {offsets = [0, 64], sizes = [2, 32], strides = [1, 1]} : vector<2x128xf32> to vector<2x32xf32>
    %260 = vector.extract_strided_slice %256 {offsets = [0, 96], sizes = [2, 32], strides = [1, 1]} : vector<2x128xf32> to vector<2x32xf32>
    %261 = arith.mulf %258, %242 : vector<2x32xf32>
    %262 = arith.mulf %257, %259 : vector<2x32xf32>
    %263 = arith.addf %261, %262 : vector<2x32xf32>
    %264 = math.tanh %263 : vector<2x32xf32>
    %265 = arith.mulf %260, %264 : vector<2x32xf32>
    %c96 = arith.constant 96 : index
    %c0_50 = arith.constant 0 : index
    %266 = vector.load %arg7[%c96, %c0_50] : memref<256x128xf32, #tpu.memory_space<vmem>>, vector<32x128xf32>
    %cst_51 = arith.constant dense<0.000000e+00> : vector<2x128xf32>
    %267 = tpu.matmul %265, %266, %cst_51 {dimension_numbers = #tpu.dot_dimension_numbers<[1], [0], [0], [1], [0, 0, 1, 1], [], []>} : vector<2x32xf32>, vector<32x128xf32>, vector<2x128xf32> -> vector<2x128xf32>
    %268 = arith.addf %247, %267 : vector<2x128xf32>
    %cst_52 = arith.constant dense<0.000000e+00> : vector<2x128xf32>
    %269 = tpu.matmul %265, %170, %cst_52 {dimension_numbers = #tpu.dot_dimension_numbers<[1], [0], [0], [1], [0, 0, 1, 1], [], []>} : vector<2x32xf32>, vector<32x128xf32>, vector<2x128xf32> -> vector<2x128xf32>
    %270 = arith.addf %179, %269 : vector<2x128xf32>
    %271 = math.tanh %270 : vector<2x128xf32>
    %272 = arith.negf %270 : vector<2x128xf32>
    %273 = math.exp %272 : vector<2x128xf32>
    %cst_53 = arith.constant 1.000000e+00 : f32
    %274 = vector.broadcast %cst_53 : f32 to vector<2x128xf32>
    %275 = arith.addf %274, %273 : vector<2x128xf32>
    %276 = arith.divf %274, %275 : vector<2x128xf32>
    %277 = arith.select %5, %271, %276 : vector<2x128xi1>, vector<2x128xf32>
    %278 = vector.extract_strided_slice %277 {offsets = [0, 0], sizes = [2, 32], strides = [1, 1]} : vector<2x128xf32> to vector<2x32xf32>
    %279 = vector.extract_strided_slice %277 {offsets = [0, 32], sizes = [2, 32], strides = [1, 1]} : vector<2x128xf32> to vector<2x32xf32>
    %280 = vector.extract_strided_slice %277 {offsets = [0, 64], sizes = [2, 32], strides = [1, 1]} : vector<2x128xf32> to vector<2x32xf32>
    %281 = vector.extract_strided_slice %277 {offsets = [0, 96], sizes = [2, 32], strides = [1, 1]} : vector<2x128xf32> to vector<2x32xf32>
    %282 = arith.mulf %279, %263 : vector<2x32xf32>
    %283 = arith.mulf %278, %280 : vector<2x32xf32>
    %284 = arith.addf %282, %283 : vector<2x32xf32>
    %285 = math.tanh %284 : vector<2x32xf32>
    %286 = arith.mulf %281, %285 : vector<2x32xf32>
    %c128 = arith.constant 128 : index
    %c0_54 = arith.constant 0 : index
    %287 = vector.load %arg7[%c128, %c0_54] : memref<256x128xf32, #tpu.memory_space<vmem>>, vector<32x128xf32>
    %cst_55 = arith.constant dense<0.000000e+00> : vector<2x128xf32>
    %288 = tpu.matmul %286, %287, %cst_55 {dimension_numbers = #tpu.dot_dimension_numbers<[1], [0], [0], [1], [0, 0, 1, 1], [], []>} : vector<2x32xf32>, vector<32x128xf32>, vector<2x128xf32> -> vector<2x128xf32>
    %289 = arith.addf %268, %288 : vector<2x128xf32>
    %cst_56 = arith.constant dense<0.000000e+00> : vector<2x128xf32>
    %290 = tpu.matmul %286, %170, %cst_56 {dimension_numbers = #tpu.dot_dimension_numbers<[1], [0], [0], [1], [0, 0, 1, 1], [], []>} : vector<2x32xf32>, vector<32x128xf32>, vector<2x128xf32> -> vector<2x128xf32>
    %291 = arith.addf %180, %290 : vector<2x128xf32>
    %292 = math.tanh %291 : vector<2x128xf32>
    %293 = arith.negf %291 : vector<2x128xf32>
    %294 = math.exp %293 : vector<2x128xf32>
    %cst_57 = arith.constant 1.000000e+00 : f32
    %295 = vector.broadcast %cst_57 : f32 to vector<2x128xf32>
    %296 = arith.addf %295, %294 : vector<2x128xf32>
    %297 = arith.divf %295, %296 : vector<2x128xf32>
    %298 = arith.select %5, %292, %297 : vector<2x128xi1>, vector<2x128xf32>
    %299 = vector.extract_strided_slice %298 {offsets = [0, 0], sizes = [2, 32], strides = [1, 1]} : vector<2x128xf32> to vector<2x32xf32>
    %300 = vector.extract_strided_slice %298 {offsets = [0, 32], sizes = [2, 32], strides = [1, 1]} : vector<2x128xf32> to vector<2x32xf32>
    %301 = vector.extract_strided_slice %298 {offsets = [0, 64], sizes = [2, 32], strides = [1, 1]} : vector<2x128xf32> to vector<2x32xf32>
    %302 = vector.extract_strided_slice %298 {offsets = [0, 96], sizes = [2, 32], strides = [1, 1]} : vector<2x128xf32> to vector<2x32xf32>
    %303 = arith.mulf %300, %284 : vector<2x32xf32>
    %304 = arith.mulf %299, %301 : vector<2x32xf32>
    %305 = arith.addf %303, %304 : vector<2x32xf32>
    %306 = math.tanh %305 : vector<2x32xf32>
    %307 = arith.mulf %302, %306 : vector<2x32xf32>
    %c160 = arith.constant 160 : index
    %c0_58 = arith.constant 0 : index
    %308 = vector.load %arg7[%c160, %c0_58] : memref<256x128xf32, #tpu.memory_space<vmem>>, vector<32x128xf32>
    %cst_59 = arith.constant dense<0.000000e+00> : vector<2x128xf32>
    %309 = tpu.matmul %307, %308, %cst_59 {dimension_numbers = #tpu.dot_dimension_numbers<[1], [0], [0], [1], [0, 0, 1, 1], [], []>} : vector<2x32xf32>, vector<32x128xf32>, vector<2x128xf32> -> vector<2x128xf32>
    %310 = arith.addf %289, %309 : vector<2x128xf32>
    %cst_60 = arith.constant dense<0.000000e+00> : vector<2x128xf32>
    %311 = tpu.matmul %307, %170, %cst_60 {dimension_numbers = #tpu.dot_dimension_numbers<[1], [0], [0], [1], [0, 0, 1, 1], [], []>} : vector<2x32xf32>, vector<32x128xf32>, vector<2x128xf32> -> vector<2x128xf32>
    %312 = arith.addf %181, %311 : vector<2x128xf32>
    %313 = math.tanh %312 : vector<2x128xf32>
    %314 = arith.negf %312 : vector<2x128xf32>
    %315 = math.exp %314 : vector<2x128xf32>
    %cst_61 = arith.constant 1.000000e+00 : f32
    %316 = vector.broadcast %cst_61 : f32 to vector<2x128xf32>
    %317 = arith.addf %316, %315 : vector<2x128xf32>
    %318 = arith.divf %316, %317 : vector<2x128xf32>
    %319 = arith.select %5, %313, %318 : vector<2x128xi1>, vector<2x128xf32>
    %320 = vector.extract_strided_slice %319 {offsets = [0, 0], sizes = [2, 32], strides = [1, 1]} : vector<2x128xf32> to vector<2x32xf32>
    %321 = vector.extract_strided_slice %319 {offsets = [0, 32], sizes = [2, 32], strides = [1, 1]} : vector<2x128xf32> to vector<2x32xf32>
    %322 = vector.extract_strided_slice %319 {offsets = [0, 64], sizes = [2, 32], strides = [1, 1]} : vector<2x128xf32> to vector<2x32xf32>
    %323 = vector.extract_strided_slice %319 {offsets = [0, 96], sizes = [2, 32], strides = [1, 1]} : vector<2x128xf32> to vector<2x32xf32>
    %324 = arith.mulf %321, %305 : vector<2x32xf32>
    %325 = arith.mulf %320, %322 : vector<2x32xf32>
    %326 = arith.addf %324, %325 : vector<2x32xf32>
    %327 = math.tanh %326 : vector<2x32xf32>
    %328 = arith.mulf %323, %327 : vector<2x32xf32>
    %c192 = arith.constant 192 : index
    %c0_62 = arith.constant 0 : index
    %329 = vector.load %arg7[%c192, %c0_62] : memref<256x128xf32, #tpu.memory_space<vmem>>, vector<32x128xf32>
    %cst_63 = arith.constant dense<0.000000e+00> : vector<2x128xf32>
    %330 = tpu.matmul %328, %329, %cst_63 {dimension_numbers = #tpu.dot_dimension_numbers<[1], [0], [0], [1], [0, 0, 1, 1], [], []>} : vector<2x32xf32>, vector<32x128xf32>, vector<2x128xf32> -> vector<2x128xf32>
    %331 = arith.addf %310, %330 : vector<2x128xf32>
    %cst_64 = arith.constant dense<0.000000e+00> : vector<2x128xf32>
    %332 = tpu.matmul %328, %170, %cst_64 {dimension_numbers = #tpu.dot_dimension_numbers<[1], [0], [0], [1], [0, 0, 1, 1], [], []>} : vector<2x32xf32>, vector<32x128xf32>, vector<2x128xf32> -> vector<2x128xf32>
    %333 = arith.addf %182, %332 : vector<2x128xf32>
    %334 = math.tanh %333 : vector<2x128xf32>
    %335 = arith.negf %333 : vector<2x128xf32>
    %336 = math.exp %335 : vector<2x128xf32>
    %cst_65 = arith.constant 1.000000e+00 : f32
    %337 = vector.broadcast %cst_65 : f32 to vector<2x128xf32>
    %338 = arith.addf %337, %336 : vector<2x128xf32>
    %339 = arith.divf %337, %338 : vector<2x128xf32>
    %340 = arith.select %5, %334, %339 : vector<2x128xi1>, vector<2x128xf32>
    %341 = vector.extract_strided_slice %340 {offsets = [0, 0], sizes = [2, 32], strides = [1, 1]} : vector<2x128xf32> to vector<2x32xf32>
    %342 = vector.extract_strided_slice %340 {offsets = [0, 32], sizes = [2, 32], strides = [1, 1]} : vector<2x128xf32> to vector<2x32xf32>
    %343 = vector.extract_strided_slice %340 {offsets = [0, 64], sizes = [2, 32], strides = [1, 1]} : vector<2x128xf32> to vector<2x32xf32>
    %344 = vector.extract_strided_slice %340 {offsets = [0, 96], sizes = [2, 32], strides = [1, 1]} : vector<2x128xf32> to vector<2x32xf32>
    %345 = arith.mulf %342, %326 : vector<2x32xf32>
    %346 = arith.mulf %341, %343 : vector<2x32xf32>
    %347 = arith.addf %345, %346 : vector<2x32xf32>
    %348 = math.tanh %347 : vector<2x32xf32>
    %349 = arith.mulf %344, %348 : vector<2x32xf32>
    %c224 = arith.constant 224 : index
    %c0_66 = arith.constant 0 : index
    %350 = vector.load %arg7[%c224, %c0_66] : memref<256x128xf32, #tpu.memory_space<vmem>>, vector<32x128xf32>
    %cst_67 = arith.constant dense<0.000000e+00> : vector<2x128xf32>
    %351 = tpu.matmul %349, %350, %cst_67 {dimension_numbers = #tpu.dot_dimension_numbers<[1], [0], [0], [1], [0, 0, 1, 1], [], []>} : vector<2x32xf32>, vector<32x128xf32>, vector<2x128xf32> -> vector<2x128xf32>
    %352 = arith.addf %331, %351 : vector<2x128xf32>
    %c0_68 = arith.constant 0 : index
    %c0_69 = arith.constant 0 : index
    %353 = vector.load %arg8[%c0_68, %c0_69] : memref<1x128xf32, #tpu.memory_space<vmem>>, vector<1x128xf32>
    %354 = vector.broadcast %353 : vector<1x128xf32> to vector<2x128xf32>
    %355 = arith.addf %352, %354 : vector<2x128xf32>
    %c0_70 = arith.constant 0 : index
    %c0_71 = arith.constant 0 : index
    %356 = vector.load %arg9[%c0_70, %c0_71] : memref<2x128xf32, #tpu.memory_space<vmem>>, vector<2x128xf32>
    tpu.vector_store %arg9[%c0_70, %c0_71], %355 {strides = array<i32>} : memref<2x128xf32, #tpu.memory_space<vmem>>, vector<2x128xf32>,
    return
  }
}

</mosaic_0001>

<bundles_post_ra>
// kernel: tpu_custom_call.1
= control target key start
LH: loop header
LB: loop body
LE: loop exit
PB: predicated region body
PF: predicated region fallthrough
CT: control target
= control target key end

     0   :  { %14 = vsyncpa [#allocation3], 0  ;;  %s4076_s0 = inlined_call_operand.hbm [shape: f32[16,16], index: 0, kind: input, shape index: {}]   ;;  %s4077_s1 = inlined_call_operand.hbm [shape: f32[16,128], index: 1, kind: input, shape index: {}]   ;;  %s4078_s2 = inlined_call_operand.hbm [shape: f32[32,128], index: 2, kind: input, shape index: {}]   ;;  %s4079_s3 = inlined_call_operand.vmem [shape: f32[1,128], index: 3, kind: input, shape index: {}]   ;;  %s4080_s4 = inlined_call_operand.hbm [shape: f32[32,128], index: 4, kind: input, shape index: {}]   ;;  %s4081_s5 = inlined_call_operand.hbm [shape: f32[32,128], index: 5, kind: input, shape index: {}]   ;;  %s4082_s6 = inlined_call_operand.vmem [shape: f32[1,128], index: 6, kind: input, shape index: {}]   ;;  %s4083_s7 = inlined_call_operand.hbm [shape: f32[256,128], index: 7, kind: input, shape index: {}]   ;;  %s4084_s8 = inlined_call_operand.vmem [shape: f32[1,128], index: 8, kind: input, shape index: {}]   ;;  %s4085_s9 = inlined_call_operand.hbm [shape: f32[2,128], index: 9, kind: output, shape index: {}]  }
   0x1   :  { %15 = vsyncpa [#allocation6], 0 }
   0x2   :  { %16 = vsyncpa [#allocation9], 0 }
   0x3   :  { %17 = vsyncpa [#allocation12], 0 }
   0x4   :  { %18 = vsyncpa [#allocation4], 0  ;;  %s3574_s30 = smov [#allocation5]   ;;  %s3575_s11 = smov [#allocation8]  }
   0x5   :  { %s36_s10 = sshll.u32 %s3574_s30, 4  ;;  %s62_s12 = sshll.u32 %s3575_s11, 4  ;;  %s37_s10 = int_to_ptr.vmem [resolvable:$true] %s36_s10  ;;  %s3638_s12 = int_to_ptr.vmem [resolvable:$true] %s62_s12 }
   0x6   :  { %s3410_s15 = scalar_lea.hbm %s4077_s1, 256 }
   0x7   :  { %p3411_p0 = scmp.ne.s32.totalorder %s4077_s1, %s3410_s15  ;;  %p3414_p1 = scmp.lt.u32.totalorder %s3410_s15, %s4077_s1 }
   0x9   :  { %p3416_p2 = pnand %p3414_p1, %p3411_p0 }
   0xb   :  { %3419 = shalt.err (!%p3416_p2)
}
   0xc   :  { %s3420_s20 = scalar_lea.vmem %s37_s10, 256  ;;  %p3425_p4 = scmp.lt.s32.totalorder %s37_s10, %s37_s10 }
   0xd   :  { %p3421_p3 = scmp.ne.s32.totalorder %s37_s10, %s3420_s20  ;;  %p3426_p5 = scmp.lt.s32.totalorder %s3420_s20, %s3420_s20 }
   0xf   :  { %p3427_p6 = por %p3426_p5, %p3425_p4 }
  0x11   :  { %p3428_p7 = pnand %p3427_p6, %p3421_p3 }
  0x13   :  { %3431 = shalt.err (!%p3428_p7)
}
  0x14   :  { %s3576_s21 = smov 128   ;;  %s3577_s22 = smov 8  }
  0x15   :  { %42 = dma.hbm_to_vmem [thread:$0]  %s4077_s1, 256, %s37_s10, [#allocation6], %s3576_s21, %s3576_s21, %s3577_s22  }
  0x16   :  { %s3432_s27 = scalar_lea.hbm %s4080_s4, 512 }
  0x17   :  { %p3433_p8 = scmp.ne.s32.totalorder %s4080_s4, %s3432_s27  ;;  %p3436_p9 = scmp.lt.u32.totalorder %s3432_s27, %s4080_s4 }
  0x19   :  { %p3438_p10 = pnand %p3436_p9, %p3433_p8 }
  0x1b   :  { %3441 = shalt.err (!%p3438_p10)
}
  0x1c   :  { %s3442_s13 = scalar_lea.vmem %s3638_s12, 512  ;;  %p3447_p12 = scmp.lt.s32.totalorder %s3638_s12, %s3638_s12 }
  0x1d   :  { %p3443_p11 = scmp.ne.s32.totalorder %s3638_s12, %s3442_s13  ;;  %p3448_p13 = scmp.lt.s32.totalorder %s3442_s13, %s3442_s13 }
  0x1f   :  { %p3449_p0 = por %p3448_p13, %p3447_p12 }
  0x21   :  { %p3450_p1 = pnand %p3449_p0, %p3443_p11 }
  0x23   :  { %3453 = shalt.err (!%p3450_p1)
}
  0x24   :  { %68 = dma.hbm_to_vmem [thread:$0]  %s4080_s4, 512, %s3638_s12, [#allocation9], %s3576_s21, %s3576_s21, %s3577_s22  }
  0x25   :  { %s3578_s14 = smov [#allocation2]   ;;  %s3579_s16 = smov [#allocation7]  }
  0x26   :  { %s24_s15 = sshll.u32 %s3578_s14, 4  ;;  %s48_s17 = sshll.u32 %s3579_s16, 4  ;;  %s25_s15 = int_to_ptr.vmem [resolvable:$true] %s24_s15  ;;  %s3675_s17 = int_to_ptr.vmem [resolvable:$true] %s48_s17 }
  0x27   :  { %s3454_s20 = scalar_lea.hbm %s4076_s0, 256 }
  0x28   :  { %p3455_p2 = scmp.ne.s32.totalorder %s4076_s0, %s3454_s20  ;;  %p3458_p3 = scmp.lt.u32.totalorder %s3454_s20, %s4076_s0 }
  0x2a   :  { %p3460_p4 = pnand %p3458_p3, %p3455_p2 }
  0x2c   :  { %3463 = shalt.err (!%p3460_p4)
}
  0x2d   :  { %s3464_s4 = scalar_lea.vmem %s25_s15, 256  ;;  %p3469_p6 = scmp.lt.s32.totalorder %s25_s15, %s25_s15 }
  0x2e   :  { %p3465_p5 = scmp.ne.s32.totalorder %s25_s15, %s3464_s4  ;;  %p3470_p7 = scmp.lt.s32.totalorder %s3464_s4, %s3464_s4 }
  0x30   :  { %p3471_p8 = por %p3470_p7, %p3469_p6 }
  0x32   :  { %p3472_p9 = pnand %p3471_p8, %p3465_p5 }
  0x34   :  { %3475 = shalt.err (!%p3472_p9)
}
  0x35   :  { %30 = dma.hbm_to_vmem [thread:$0]  %s4076_s0, 256, %s25_s15, [#allocation3], %s3576_s21, %s3576_s21, %s3577_s22  }
  0x36   :  { %s3476_s30 = scalar_lea.hbm %s4078_s2, 512 }
  0x37   :  { %p3477_p10 = scmp.ne.s32.totalorder %s4078_s2, %s3476_s30  ;;  %p3480_p11 = scmp.lt.u32.totalorder %s3476_s30, %s4078_s2 }
  0x39   :  { %p3482_p12 = pnand %p3480_p11, %p3477_p10 }
  0x3b   :  { %3485 = shalt.err (!%p3482_p12)
}
  0x3c   :  { %s3486_s14 = scalar_lea.vmem %s3675_s17, 512  ;;  %p3491_p0 = scmp.lt.s32.totalorder %s3675_s17, %s3675_s17 }
  0x3d   :  { %p3487_p13 = scmp.ne.s32.totalorder %s3675_s17, %s3486_s14  ;;  %p3492_p1 = scmp.lt.s32.totalorder %s3486_s14, %s3486_s14 }
  0x3f   :  { %p3493_p2 = por %p3492_p1, %p3491_p0 }
  0x41   :  { %p3494_p3 = pnand %p3493_p2, %p3487_p13 }
  0x43   :  { %3497 = shalt.err (!%p3494_p3)
}
  0x44   :  { %54 = dma.hbm_to_vmem [thread:$0]  %s4078_s2, 512, %s3675_s17, [#allocation6], %s3576_s21, %s3576_s21, %s3577_s22  }
  0x45   :  { %s3580_s16 = smov [#allocation10]   ;;  %s3581_s19 = smov [#allocation11]  }
  0x46   :  { %s74_s18 = sshll.u32 %s3580_s16, 4  ;;  %s88_s20 = sshll.u32 %s3581_s19, 4  ;;  %s75_s18 = int_to_ptr.vmem [resolvable:$true] %s74_s18  ;;  %s3712_s20 = int_to_ptr.vmem [resolvable:$true] %s88_s20 }
  0x47   :  { %s3498_s25 = scalar_lea.hbm %s4081_s5, 512 }
  0x48   :  { %p3499_p4 = scmp.ne.s32.totalorder %s4081_s5, %s3498_s25  ;;  %p3502_p5 = scmp.lt.u32.totalorder %s3498_s25, %s4081_s5 }
  0x4a   :  { %p3504_p6 = pnand %p3502_p5, %p3499_p4 }
  0x4c   :  { %3507 = shalt.err (!%p3504_p6)
}
  0x4d   :  { %s3508_s2 = scalar_lea.vmem %s75_s18, 512  ;;  %p3513_p8 = scmp.lt.s32.totalorder %s75_s18, %s75_s18 }
  0x4e   :  { %p3509_p7 = scmp.ne.s32.totalorder %s75_s18, %s3508_s2  ;;  %p3514_p9 = scmp.lt.s32.totalorder %s3508_s2, %s3508_s2 }
  0x50   :  { %p3515_p10 = por %p3514_p9, %p3513_p8 }
  0x52   :  { %p3516_p11 = pnand %p3515_p10, %p3509_p7 }
  0x54   :  { %3519 = shalt.err (!%p3516_p11)
}
  0x55   :  { %80 = dma.hbm_to_vmem [thread:$0]  %s4081_s5, 512, %s75_s18, [#allocation9], %s3576_s21, %s3576_s21, %s3577_s22  }
  0x56   :  { %s3520_s11 = scalar_lea.hbm %s4083_s7, 4096 }
  0x57   :  { %p3521_p12 = scmp.ne.s32.totalorder %s4083_s7, %s3520_s11  ;;  %p3524_p13 = scmp.lt.u32.totalorder %s3520_s11, %s4083_s7 }
  0x59   :  { %p3526_p0 = pnand %p3524_p13, %p3521_p12 }
  0x5b   :  { %3529 = shalt.err (!%p3526_p0)
}
  0x5c   :  { %s3530_s0 = scalar_lea.vmem %s3712_s20, 4096  ;;  %p3535_p2 = scmp.lt.s32.totalorder %s3712_s20, %s3712_s20 }
  0x5d   :  { %p3531_p1 = scmp.ne.s32.totalorder %s3712_s20, %s3530_s0  ;;  %p3536_p3 = scmp.lt.s32.totalorder %s3530_s0, %s3530_s0 }
  0x5f   :  { %p3537_p4 = por %p3536_p3, %p3535_p2 }
  0x61   :  { %p3538_p5 = pnand %p3537_p4, %p3531_p1 }
  0x63   :  { %3541 = shalt.err (!%p3538_p5)
}
  0x64   :  { %94 = dma.hbm_to_vmem [thread:$0]  %s4083_s7, 4096, %s3712_s20, [#allocation12], %s3576_s21, %s3576_s21, %s3577_s22  }
  0x65   :  { %3564 = dma.done.wait [#allocation3], 256  }
  0x66   :  { %3565 = vsyncadd [#allocation3], 4294967040 }
  0x67   :  { %3566 = dma.done.wait [#allocation6], 768  }
  0x68   :  { %3567 = vsyncadd [#allocation6], 4294966528 }
  0x69   :  { %3568 = dma.done.wait [#allocation9], 1024  }
  0x6a   :  { %3569 = vsyncadd [#allocation9], 4294966272 }
  0x6b   :  { %3570 = dma.done.wait [#allocation12], 4096  }
  0x6c   :  { %3571 = vsyncadd [#allocation12], 4294963200  ;;  %v3582_v0 = vmov 0.0|0.0   ;;  %vm3583_vm0 = vmmov 0   ;;  %v3584_v1 = vmov 0.0   ;;  %vm135_vm1 = vcmask 130048  }
  0x6d   :  { %3116 = vmatprep.subr.bf16.mxu1 %v3582_v0  ;;  %2845 = vmatprep.mubr.msk.f32.mxu1 %vm3583_vm0, %v3584_v1  ;;  %v122_v2 = vld [vmem:[#allocation5] sm:$0xff]  ;;  %v123_v3 = vld [vmem:[#allocation5 + $0x8] sm:$0xff]  ;;  %v124_v4 = vld [vmem:[#allocation7] sm:$0xff]  ;;  %v115_v23 = vlaneseq  ;;  %s3586_s22 = smov 32   ;;  %vm217_vm5 = vcmask 261120   ;;  %vm1068_vm6 = vcmask 1041408  }
  0x6e   :  { %v3112_v5 = vpack.c.bf16 %v123_v3, %v122_v2  ;;  %v125_v6 = vld [vmem:[#allocation7 + $0x8] sm:$0xff]  ;;  %v120_v7 = vld [vmem:[#allocation2] sm:$0xff]  ;;  %v126_v9 = vld [vmem:[#allocation7 + $0x10] sm:$0xff]  ;;  %vm1070_vm7 = vcmask 1043456   ;;  %vm1072_vm8 = vcmask 1045504   ;;  %s3587_s20 = smov [#allocation13]  }
  0x6f   :  { %v3752_v8 = vpack.c.bf16 %v125_v6, %v124_v4  ;;  %2834 = vmatprep.mubr.msk.f32.mxu0 %vm135_vm1, %v120_v7  ;;  %v127_v10 = vld [vmem:[#allocation7 + $0x18] sm:$0xff]  ;;  %v121_v11 = vld [vmem:[#allocation2 + $0x8] sm:$0xff]  ;;  %v2655_v13 = vld [vmem:[%s4079_s3] ss:$0 sm:$0xff]  ;;  %v116_v25 = vand.u32 127, %v115_v23  ;;  %s3585_s3 = smov 64  }
  0x70   :  { %3113 = vmatprep.subr.bf16.mxu0 %v3112_v5  ;;  %v3756_v12 = vpack.c.bf16 %v127_v10, %v126_v9  ;;  %s2643_s23 = sshll.u32 %s3587_s20, 4  ;;  %s2644_s23 = int_to_ptr.vmem [resolvable:$true] %s2643_s23 }
  0x71   :  { %3118 = vmatpush3.bf16.msra.mxu1 %v3752_v8  ;;  %3115 = vmatpush3.bf16.msra.mxu0 %v3112_v5  ;;  %vm117_vm2 = vcmp.ge.s32.totalorder %v116_v25, 64  ;;  %vm118_vm3 = vcmp.lt.s32.totalorder %v116_v25, 96  ;;  %s3542_s24 = scalar_lea.vmem %s2644_s23, 32  ;;  %p3547_p7 = scmp.lt.s32.totalorder %s2644_s23, %s2644_s23 }
  0x72   :  { %3119 = vmatprep.subr.bf16.mxu1 %v3582_v0  ;;  %3122 = vmatprep.subr.bf16.mxu0 %v3582_v0  ;;  %vm3784_vm4 = vmand %vm117_vm2, %vm118_vm3  ;;  %p3543_p6 = scmp.ne.s32.totalorder %s2644_s23, %s3542_s24  ;;  %p3548_p8 = scmp.lt.s32.totalorder %s3542_s24, %s3542_s24 }
  0x74   :  { %2835 = vmatmul.mubr.msk.f32.vlgmr.msra.gmra.mrb[0].mxu0 %vm135_vm1, %v121_v11  ;;  %p3549_p9 = por %p3548_p8, %p3547_p7 }
  0x75   :  { %3121 = vmatpush3.bf16.msra.mxu1 %v3756_v12  ;;  %3124 = vmatpush3.bf16.msra.mxu0 %v3752_v8 }
  0x76   :  { %3125 = vmatprep.subr.bf16.mxu0 %v3582_v0  ;;  %2856 = vmatprep.mubr.msk.f32.mxu0 %vm3583_vm0, %v3584_v1  ;;  %p3550_p10 = pnand %p3549_p9, %p3543_p6 }
  0x77   :  { %3128 = vmatprep.subr.bf16.mxu1 %v3582_v0 }
  0x78   :  { %2846 = vmatmul.mubr.f32.vlgmr.msra.gmra.mrb[0].mxu1 %v3584_v1 }
  0x79   :  { %3127 = vmatpush3.bf16.msra.mxu0 %v3756_v12  ;;  %3130 = vmatpush3.bf16.msra.mxu1 %v3752_v8 }
  0x7a   :  { %3131 = vmatprep.subr.bf16.mxu1 %v3582_v0  ;;  %2867 = vmatprep.mubr.msk.f32.mxu1 %vm3583_vm0, %v3584_v1 }
  0x7b   :  { %3134 = vmatprep.subr.bf16.mxu0 %v3582_v0 }
  0x7d   :  { %3133 = vmatpush3.bf16.msra.mxu1 %v3756_v12 }
  0x7e   :  { %3140 = vmatprep.subr.bf16.mxu1 %v3582_v0 }
 0x147   :  { %v2836_v14 = vpop.f32.mrb[0].mxu0 }
 0x148   :  { %v3779_v15 = vadd.f32 %v2836_v14, %v2655_v13  ;;  %v208_v16 = vpop.f32.mrb[1].mxu0 }
 0x149   :  { %v3781_v17 = vadd.f32 %v2655_v13, %v208_v16 }
 0x14b   :  { %v287_v18 = vpop.f32.mrb[0].mxu1 }
 0x14c   :  { %v291_v19 = vadd.f32 %v287_v18, %v3781_v17  ;;  %v2847_v20 = vpop.f32.mrb[1].mxu1 }
 0x14e   :  { %v2658_v21 = vmul.f32 -1.442695, %v291_v19 }
 0x150   :  { %3282 = vpow2.f32 %v2658_v21 }
 0x151   :  { %3284 = vtanh.f32 %v291_v19 }
 0x15a   :  { %v3283_v22 = vpop.eup %3282 }
 0x15b   :  { %v296_v24 = vadd.f32 1.0, %v3283_v22  ;;  %v3285_v27 = vpop.eup %3284 }
 0x15d   :  { %3286 = vrcp.f32 %v296_v24 }
 0x167   :  { %v3287_v28 = vpop.eup %3286 }
 0x168   :  { %v299_v29 = vsel %vm3784_vm4, %v3285_v27, %v3287_v28 }
 0x169   :  { %302 = vrot.lane.b32.xlu0 %v299_v29, %s3585_s3  ;;  %v300_v32 = vmul.f32 0.0, %v299_v29 }
 0x1db   :  { %v303_v30 = vpop.permute.xlu0 %302 }
 0x1dc   :  { %v305_v31 = vmul.f32 %v303_v30, %v299_v29 }
 0x1de   :  { %307 = vrot.lane.b32.xlu0 %v305_v31, %s3586_s22 }
 0x250   :  { %v308_v33 = vpop.permute.xlu0 %307 }
 0x251   :  { %v310_v34 = vadd.f32 %v308_v33, %v300_v32 }
 0x253   :  { %3288 = vtanh.f32 %v310_v34  ;;  %v405_v51 = vrot.slane %v310_v34, 6 }
 0x25d   :  { %v3289_v35 = vpop.eup %3288 }
 0x25e   :  { %313 = vrot.lane.b32.xlu1 %v3289_v35, %s3585_s3 }
 0x2d0   :  { %v314_v36 = vpop.permute.xlu1 %313 }
 0x2d1   :  { %v3793_v37 = vmul.f32 %v314_v36, %v299_v29 }
 0x2d3   :  { %318 = vrot.lane.b32.xlu1 %v3793_v37, %s3586_s22 }
 0x345   :  { %v319_v38 = vpop.permute.xlu1 %318 }
 0x346   :  { %2857 = vmatmul.mubr.msk.f32.vlgmr.msra.gmra.mrb[2].mxu0 %vm217_vm5, %v319_v38 }
 0x347   :  { %3136 = vmatpush3.bf16.msra.mxu0 %v3752_v8  ;;  %2878 = vmatprep.mubr.msk.f32.mxu0 %vm3583_vm0, %v3584_v1 }
 0x348   :  { %3137 = vmatprep.subr.bf16.mxu0 %v3582_v0 }
 0x34b   :  { %3139 = vmatpush3.bf16.msra.mxu0 %v3756_v12 }
 0x34c   :  { %3146 = vmatprep.subr.bf16.mxu0 %v3582_v0 }
 0x419   :  { %v388_v39 = vpop.f32.mrb[2].mxu0 }
 0x41a   :  { %v393_v40 = vrot.slane %v388_v39, 6  ;;  %v2858_v41 = vpop.f32.mrb[3].mxu0 }
 0x41c   :  { %v395_v42 = vadd.f32 %v393_v40, %v3781_v17 }
 0x41e   :  { %v2660_v43 = vmul.f32 -1.442695, %v395_v42 }
 0x420   :  { %3290 = vpow2.f32 %v2660_v43 }
 0x421   :  { %3292 = vtanh.f32 %v395_v42 }
 0x42a   :  { %v3291_v44 = vpop.eup %3290 }
 0x42b   :  { %v400_v45 = vadd.f32 1.0, %v3291_v44  ;;  %v3293_v46 = vpop.eup %3292 }
 0x42d   :  { %3294 = vrcp.f32 %v400_v45 }
 0x437   :  { %v3295_v47 = vpop.eup %3294 }
 0x438   :  { %v403_v48 = vsel %vm3784_vm4, %v3293_v46, %v3295_v47 }
 0x439   :  { %409 = vrot.lane.b32.xlu0 %v403_v48, %s3585_s3  ;;  %v407_v52 = vmul.f32 %v405_v51, %v403_v48 }
 0x4ab   :  { %v410_v49 = vpop.permute.xlu0 %409 }
 0x4ac   :  { %v412_v50 = vmul.f32 %v410_v49, %v403_v48 }
 0x4ae   :  { %414 = vrot.lane.b32.xlu1 %v412_v50, %s3586_s22 }
 0x520   :  { %v415_v53 = vpop.permute.xlu1 %414 }
 0x521   :  { %v417_v54 = vadd.f32 %v415_v53, %v407_v52 }
 0x523   :  { %3296 = vtanh.f32 %v417_v54  ;;  %v513_v11 = vrot.slane %v417_v54, 6 }
 0x52d   :  { %v3297_v55 = vpop.eup %3296 }
 0x52e   :  { %420 = vrot.lane.b32.xlu0 %v3297_v55, %s3585_s3 }
 0x5a0   :  { %v421_v56 = vpop.permute.xlu0 %420 }
 0x5a1   :  { %v423_v57 = vmul.f32 %v421_v56, %v403_v48 }
 0x5a3   :  { %v425_v58 = vrot.slane %v423_v57, 2  ;;  %v1069_v21 = vsel %vm1068_vm6, %v3793_v37, %v423_v57 }
 0x5a5   :  { %426 = vrot.lane.b32.xlu1 %v425_v58, %s3586_s22 }
 0x617   :  { %v427_v59 = vpop.permute.xlu1 %426 }
 0x618   :  { %2868 = vmatmul.mubr.msk.f32.vlgmr.msra.gmra.mrb[2].mxu1 %vm217_vm5, %v427_v59 }
 0x619   :  { %3142 = vmatpush3.bf16.msra.mxu1 %v3752_v8  ;;  %2889 = vmatprep.mubr.msk.f32.mxu1 %vm3583_vm0, %v3584_v1 }
 0x61a   :  { %3143 = vmatprep.subr.bf16.mxu1 %v3582_v0 }
 0x61d   :  { %3145 = vmatpush3.bf16.msra.mxu1 %v3756_v12 }
 0x61e   :  { %3152 = vmatprep.subr.bf16.mxu1 %v3582_v0 }
 0x6eb   :  { %v496_v60 = vpop.f32.mrb[2].mxu1 }
 0x6ec   :  { %v501_v61 = vrot.slane %v496_v60, 4  ;;  %v2869_v62 = vpop.f32.mrb[3].mxu1 }
 0x6ee   :  { %v503_v63 = vadd.f32 %v501_v61, %v3781_v17 }
 0x6f0   :  { %v2662_v2 = vmul.f32 -1.442695, %v503_v63 }
 0x6f2   :  { %3298 = vpow2.f32 %v2662_v2 }
 0x6f3   :  { %3300 = vtanh.f32 %v503_v63 }
 0x6fc   :  { %v3299_v3 = vpop.eup %3298 }
 0x6fd   :  { %v508_v4 = vadd.f32 1.0, %v3299_v3  ;;  %v3301_v5 = vpop.eup %3300 }
 0x6ff   :  { %3302 = vrcp.f32 %v508_v4 }
 0x709   :  { %v3303_v6 = vpop.eup %3302 }
 0x70a   :  { %v511_v7 = vsel %vm3784_vm4, %v3301_v5, %v3303_v6 }
 0x70b   :  { %517 = vrot.lane.b32.xlu0 %v511_v7, %s3585_s3  ;;  %v515_v13 = vmul.f32 %v513_v11, %v511_v7 }
 0x77d   :  { %v518_v9 = vpop.permute.xlu0 %517 }
 0x77e   :  { %v520_v10 = vmul.f32 %v518_v9, %v511_v7 }
 0x780   :  { %522 = vrot.lane.b32.xlu1 %v520_v10, %s3586_s22 }
 0x7f2   :  { %v523_v14 = vpop.permute.xlu1 %522 }
 0x7f3   :  { %v525_v16 = vadd.f32 %v523_v14, %v515_v13 }
 0x7f5   :  { %3304 = vtanh.f32 %v525_v16  ;;  %v621_v38 = vrot.slane %v525_v16, 6 }
 0x7ff   :  { %v3305_v18 = vpop.eup %3304 }
 0x800   :  { %528 = vrot.lane.b32.xlu0 %v3305_v18, %s3585_s3 }
 0x872   :  { %v529_v19 = vpop.permute.xlu0 %528 }
 0x873   :  { %v531_v20 = vmul.f32 %v529_v19, %v511_v7 }
 0x875   :  { %v533_v22 = vrot.slane %v531_v20, 4  ;;  %v1071_v23 = vsel %vm1070_vm7, %v1069_v21, %v531_v20 }
 0x877   :  { %534 = vrot.lane.b32.xlu1 %v533_v22, %s3586_s22 }
 0x8e9   :  { %v535_v24 = vpop.permute.xlu1 %534 }
 0x8ea   :  { %2879 = vmatmul.mubr.msk.f32.vlgmr.msra.gmra.mrb[4].mxu0 %vm217_vm5, %v535_v24 }
 0x8eb   :  { %3148 = vmatpush3.bf16.msra.mxu0 %v3752_v8  ;;  %2900 = vmatprep.mubr.msk.f32.mxu0 %vm3583_vm0, %v3584_v1 }
 0x8ec   :  { %3149 = vmatprep.subr.bf16.mxu0 %v3582_v0 }
 0x8ef   :  { %3151 = vmatpush3.bf16.msra.mxu0 %v3756_v12 }
 0x8f0   :  { %3158 = vmatprep.subr.bf16.mxu0 %v3582_v0 }
 0x9bd   :  { %v604_v25 = vpop.f32.mrb[4].mxu0 }
 0x9be   :  { %v609_v27 = vrot.slane %v604_v25, 2  ;;  %v2880_v28 = vpop.f32.mrb[5].mxu0 }
 0x9c0   :  { %v611_v29 = vadd.f32 %v609_v27, %v3781_v17 }
 0x9c2   :  { %v2664_v30 = vmul.f32 -1.442695, %v611_v29 }
 0x9c4   :  { %3306 = vpow2.f32 %v2664_v30 }
 0x9c5   :  { %3308 = vtanh.f32 %v611_v29 }
 0x9ce   :  { %v3307_v31 = vpop.eup %3306 }
 0x9cf   :  { %v616_v32 = vadd.f32 1.0, %v3307_v31  ;;  %v3309_v33 = vpop.eup %3308 }
 0x9d1   :  { %3310 = vrcp.f32 %v616_v32 }
 0x9db   :  { %v3311_v34 = vpop.eup %3310 }
 0x9dc   :  { %v619_v35 = vsel %vm3784_vm4, %v3309_v33, %v3311_v34 }
 0x9dd   :  { %625 = vrot.lane.b32.xlu0 %v619_v35, %s3585_s3  ;;  %v623_v39 = vmul.f32 %v621_v38, %v619_v35 }
 0xa4f   :  { %v626_v36 = vpop.permute.xlu0 %625 }
 0xa50   :  { %v628_v37 = vmul.f32 %v626_v36, %v619_v35 }
 0xa52   :  { %630 = vrot.lane.b32.xlu1 %v628_v37, %s3586_s22 }
 0xac4   :  { %v631_v17 = vpop.permute.xlu1 %630 }
 0xac5   :  { %v633_v40 = vadd.f32 %v631_v17, %v623_v39 }
 0xac7   :  { %3312 = vtanh.f32 %v633_v40  ;;  %v726_v58 = vrot.slane %v633_v40, 6 }
 0xad1   :  { %v3313_v41 = vpop.eup %3312 }
 0xad2   :  { %636 = vrot.lane.b32.xlu0 %v3313_v41, %s3585_s3 }
 0xb44   :  { %v637_v42 = vpop.permute.xlu0 %636 }
 0xb45   :  { %v639_v43 = vmul.f32 %v637_v42, %v619_v35 }
 0xb47   :  { %v641_v44 = vrot.slane %v639_v43, 6  ;;  %v3842_v45 = vsel %vm1072_vm8, %v1071_v23, %v639_v43 }
 0xb49   :  { %642 = vrot.lane.b32.xlu1 %v641_v44, %s3586_s22 }
 0xbbb   :  { %v643_v46 = vpop.permute.xlu1 %642 }
 0xbbc   :  { %2890 = vmatmul.mubr.msk.f32.vlgmr.msra.gmra.mrb[4].mxu1 %vm217_vm5, %v643_v46 }
 0xbbd   :  { %3154 = vmatpush3.bf16.msra.mxu1 %v3752_v8  ;;  %2911 = vmatprep.mubr.msk.f32.mxu1 %vm3583_vm0, %v3584_v1 }
 0xbbe   :  { %3155 = vmatprep.subr.bf16.mxu1 %v3582_v0 }
 0xbc1   :  { %3157 = vmatpush3.bf16.msra.mxu1 %v3756_v12 }
 0xc8f   :  { %v712_v47 = vpop.f32.mrb[4].mxu1 }
 0xc90   :  { %v716_v48 = vadd.f32 %v712_v47, %v3779_v15  ;;  %v2891_v49 = vpop.f32.mrb[5].mxu1 }
 0xc92   :  { %v2666_v50 = vmul.f32 -1.442695, %v716_v48 }
 0xc94   :  { %3314 = vpow2.f32 %v2666_v50 }
 0xc95   :  { %3316 = vtanh.f32 %v716_v48 }
 0xc9e   :  { %v3315_v51 = vpop.eup %3314 }
 0xc9f   :  { %v721_v52 = vadd.f32 1.0, %v3315_v51  ;;  %v3317_v53 = vpop.eup %3316 }
 0xca1   :  { %3318 = vrcp.f32 %v721_v52 }
 0xcab   :  { %v3319_v54 = vpop.eup %3318 }
 0xcac   :  { %v724_v55 = vsel %vm3784_vm4, %v3317_v53, %v3319_v54 }
 0xcad   :  { %730 = vrot.lane.b32.xlu0 %v724_v55, %s3585_s3  ;;  %v728_v59 = vmul.f32 %v726_v58, %v724_v55 }
 0xd1f   :  { %v731_v56 = vpop.permute.xlu0 %730 }
 0xd20   :  { %v733_v57 = vmul.f32 %v731_v56, %v724_v55 }
 0xd22   :  { %735 = vrot.lane.b32.xlu1 %v733_v57, %s3586_s22 }
 0xd94   :  { %v736_v60 = vpop.permute.xlu1 %735 }
 0xd95   :  { %v738_v61 = vadd.f32 %v736_v60, %v728_v59 }
 0xd97   :  { %3320 = vtanh.f32 %v738_v61  ;;  %v833_v18 = vrot.slane %v738_v61, 6 }
 0xda1   :  { %v3321_v62 = vpop.eup %3320 }
 0xda2   :  { %741 = vrot.lane.b32.xlu0 %v3321_v62, %s3585_s3 }
 0xe14   :  { %v742_v63 = vpop.permute.xlu0 %741 }
 0xe15   :  { %v3857_v2 = vmul.f32 %v742_v63, %v724_v55 }
 0xe17   :  { %746 = vrot.lane.b32.xlu1 %v3857_v2, %s3586_s22 }
 0xe89   :  { %v747_v3 = vpop.permute.xlu1 %746 }
 0xe8a   :  { %2901 = vmatmul.mubr.msk.f32.vlgmr.msra.gmra.mrb[6].mxu0 %vm217_vm5, %v747_v3 }
 0xe8b   :  { %3160 = vmatpush3.bf16.msra.mxu0 %v3752_v8  ;;  %2922 = vmatprep.mubr.msk.f32.mxu0 %vm3583_vm0, %v3584_v1 }
 0xe8c   :  { %3161 = vmatprep.subr.bf16.mxu0 %v3582_v0 }
 0xe8f   :  { %3163 = vmatpush3.bf16.msra.mxu0 %v3756_v12 }
 0xe90   :  { %3172 = vmatprep.subr.bf16.mxu0 %v3582_v0 }
 0xf5d   :  { %v816_v4 = vpop.f32.mrb[6].mxu0 }
 0xf5e   :  { %v821_v5 = vrot.slane %v816_v4, 6  ;;  %v2902_v6 = vpop.f32.mrb[7].mxu0 }
 0xf5f   :  { %v1078_v6 = vld [vmem:[#allocation8 + $0x8] sm:$0xff] }
 0xf60   :  { %v823_v7 = vadd.f32 %v821_v5, %v3779_v15  ;;  %v1077_v5 = vld [vmem:[#allocation8] sm:$0xff] }
 0xf62   :  { %v2668_v9 = vmul.f32 -1.442695, %v823_v7 }
 0xf64   :  { %3322 = vpow2.f32 %v2668_v9  ;;  %v3164_v9 = vpack.c.bf16 %v1078_v6, %v1077_v5 }
 0xf65   :  { %3324 = vtanh.f32 %v823_v7  ;;  %v1081_v7 = vld [vmem:[#allocation10] sm:$0xff] }
 0xf66   :  { %3165 = vmatprep.subr.bf16.mxu1 %v3164_v9 }
 0xf6e   :  { %v3323_v10 = vpop.eup %3322 }
 0xf6f   :  { %v828_v11 = vadd.f32 1.0, %v3323_v10  ;;  %v3325_v8 = vpop.eup %3324  ;;  %v1082_v10 = vld [vmem:[#allocation10 + $0x8] sm:$0xff] }
 0xf71   :  { %3326 = vrcp.f32 %v828_v11  ;;  %v1079_v11 = vld [vmem:[#allocation8 + $0x10] sm:$0xff] }
 0xf7b   :  { %v3327_v13 = vpop.eup %3326 }
 0xf7c   :  { %v831_v14 = vsel %vm3784_vm4, %v3325_v8, %v3327_v13  ;;  %v1080_v8 = vld [vmem:[#allocation8 + $0x18] sm:$0xff]  ;;  %v3897_v13 = vpack.c.bf16 %v1082_v10, %v1081_v7  ;;  %v1385_v10 = vld [vmem:[#allocation11 + $0x28] sm:$0xff] }
 0xf7d   :  { %837 = vrot.lane.b32.xlu0 %v831_v14, %s3585_s3  ;;  %v835_v19 = vmul.f32 %v833_v18, %v831_v14 }
 0xfef   :  { %v838_v12 = vpop.permute.xlu0 %837 }
 0xff0   :  { %v840_v16 = vmul.f32 %v838_v12, %v831_v14  ;;  %v1083_v12 = vld [vmem:[#allocation10 + $0x10] sm:$0xff] }
 0xff2   :  { %842 = vrot.lane.b32.xlu1 %v840_v16, %s3586_s22 }
0x1064   :  { %v843_v20 = vpop.permute.xlu1 %842 }
0x1065   :  { %v845_v21 = vadd.f32 %v843_v20, %v835_v19 }
0x1067   :  { %3328 = vtanh.f32 %v845_v21  ;;  %v941_v17 = vrot.slane %v845_v21, 6 }
0x1071   :  { %v3329_v22 = vpop.eup %3328 }
0x1072   :  { %848 = vrot.lane.b32.xlu0 %v3329_v22, %s3585_s3 }
0x10e4   :  { %v849_v23 = vpop.permute.xlu0 %848 }
0x10e5   :  { %v851_v24 = vmul.f32 %v849_v23, %v831_v14  ;;  %v3168_v14 = vpack.c.bf16 %v1080_v8, %v1079_v11  ;;  %v1386_v11 = vld [vmem:[#allocation11 + $0x30] sm:$0xff] }
0x10e7   :  { %v853_v25 = vrot.slane %v851_v24, 2  ;;  %v1074_v47 = vsel %vm1068_vm6, %v3857_v2, %v851_v24 }
0x10e9   :  { %854 = vrot.lane.b32.xlu1 %v853_v25, %s3586_s22  ;;  %v2673_v25 = vld [vmem:[%s4082_s6] ss:$0 sm:$0xff] }
0x115b   :  { %v855_v27 = vpop.permute.xlu1 %854 }
0x115c   :  { %2912 = vmatmul.mubr.msk.f32.vlgmr.msra.gmra.mrb[6].mxu1 %vm217_vm5, %v855_v27 }
0x115d   :  { %3167 = vmatpush3.bf16.msra.mxu1 %v3164_v9  ;;  %v1384_v9 = vld [vmem:[#allocation11 + $0x20] sm:$0xff] }
0x115e   :  { %3169 = vmatprep.subr.bf16.mxu1 %v3168_v14  ;;  %v3185_v8 = vpack.c.bf16 %v1385_v10, %v1384_v9 }
0x1161   :  { %3171 = vmatpush3.bf16.msra.mxu1 %v3168_v14  ;;  %v1387_v14 = vld [vmem:[#allocation11 + $0x38] sm:$0xff] }
0x1162   :  { %3178 = vmatprep.subr.bf16.mxu1 %v3582_v0 }
0x122f   :  { %v924_v28 = vpop.f32.mrb[6].mxu1 }
0x1230   :  { %v929_v29 = vrot.slane %v924_v28, 4  ;;  %v2913_v30 = vpop.f32.mrb[7].mxu1 }
0x1232   :  { %v931_v31 = vadd.f32 %v929_v29, %v3779_v15 }
0x1234   :  { %v2670_v32 = vmul.f32 -1.442695, %v931_v31 }
0x1236   :  { %3330 = vpow2.f32 %v2670_v32 }
0x1237   :  { %3332 = vtanh.f32 %v931_v31 }
0x1240   :  { %v3331_v33 = vpop.eup %3330 }
0x1241   :  { %v936_v34 = vadd.f32 1.0, %v3331_v33  ;;  %v3333_v35 = vpop.eup %3332 }
0x1243   :  { %3334 = vrcp.f32 %v936_v34 }
0x124d   :  { %v3335_v36 = vpop.eup %3334 }
0x124e   :  { %v939_v37 = vsel %vm3784_vm4, %v3333_v35, %v3335_v36 }
0x124f   :  { %945 = vrot.lane.b32.xlu0 %v939_v37, %s3585_s3  ;;  %v943_v40 = vmul.f32 %v941_v17, %v939_v37 }
0x12c1   :  { %v946_v38 = vpop.permute.xlu0 %945 }
0x12c2   :  { %v948_v39 = vmul.f32 %v946_v38, %v939_v37 }
0x12c4   :  { %950 = vrot.lane.b32.xlu1 %v948_v39, %s3586_s22 }
0x1336   :  { %v951_v41 = vpop.permute.xlu1 %950 }
0x1337   :  { %v953_v42 = vadd.f32 %v951_v41, %v943_v40 }
0x1339   :  { %3336 = vtanh.f32 %v953_v42 }
0x1343   :  { %v3337_v43 = vpop.eup %3336 }
0x1344   :  { %956 = vrot.lane.b32.xlu0 %v3337_v43, %s3585_s3 }
0x13b6   :  { %v957_v44 = vpop.permute.xlu0 %956 }
0x13b7   :  { %v959_v46 = vmul.f32 %v957_v44, %v939_v37 }
0x13b9   :  { %v961_v48 = vrot.slane %v959_v46, 4  ;;  %v1075_v49 = vsel %vm1070_vm7, %v1074_v47, %v959_v46  ;;  %v1273_v46 = vld [vmem:[#allocation11] sm:$0xff]  ;;  %v1274_v47 = vld [vmem:[#allocation11 + $0x8] sm:$0xff] }
0x13bb   :  { %962 = vrot.lane.b32.xlu1 %v961_v48, %s3586_s22  ;;  %v3191_v48 = vpack.c.bf16 %v1274_v47, %v1273_v46  ;;  %v1638_v46 = vld [vmem:[#allocation11 + $0x50] sm:$0xff] }
0x142d   :  { %v963_v50 = vpop.permute.xlu1 %962 }
0x142e   :  { %2923 = vmatmul.mubr.msk.f32.vlgmr.msra.gmra.mrb[8].mxu0 %vm217_vm5, %v963_v50  ;;  %v1276_v50 = vld [vmem:[#allocation11 + $0x18] sm:$0xff] }
0x142f   :  { %2944 = vmatprep.mubr.msk.f32.mxu0 %vm3583_vm0, %v3584_v1  ;;  %3174 = vmatpush3.bf16.msra.mxu0 %v3897_v13 }
0x1430   :  { %3175 = vmatprep.subr.bf16.mxu0 %v3582_v0 }
0x1501   :  { %v1032_v51 = vpop.f32.mrb[8].mxu0 }
0x1502   :  { %v1037_v52 = vrot.slane %v1032_v51, 2  ;;  %v2924_v53 = vpop.f32.mrb[9].mxu0 }
0x1504   :  { %v1039_v54 = vadd.f32 %v1037_v52, %v3779_v15  ;;  %v1049_v15 = vrot.slane %v953_v42, 6 }
0x1506   :  { %v2672_v55 = vmul.f32 -1.442695, %v1039_v54 }
0x1508   :  { %3338 = vpow2.f32 %v2672_v55 }
0x1509   :  { %3340 = vtanh.f32 %v1039_v54 }
0x1512   :  { %v3339_v56 = vpop.eup %3338 }
0x1513   :  { %v1044_v57 = vadd.f32 1.0, %v3339_v56  ;;  %v3341_v58 = vpop.eup %3340 }
0x1515   :  { %3342 = vrcp.f32 %v1044_v57 }
0x151f   :  { %v3343_v59 = vpop.eup %3342 }
0x1520   :  { %v1047_v60 = vsel %vm3784_vm4, %v3341_v58, %v3343_v59 }
0x1521   :  { %1053 = vrot.lane.b32.xlu0 %v1047_v60, %s3585_s3  ;;  %v1051_v63 = vmul.f32 %v1049_v15, %v1047_v60 }
0x1593   :  { %v1054_v61 = vpop.permute.xlu0 %1053 }
0x1594   :  { %v1056_v62 = vmul.f32 %v1054_v61, %v1047_v60 }
0x1596   :  { %1058 = vrot.lane.b32.xlu1 %v1056_v62, %s3586_s22 }
0x159a   :  { %1094 = vrot.lane.b32.xlu1 %v3842_v45, %s3586_s22  ;;  %v1084_v45 = vld [vmem:[#allocation10 + $0x18] sm:$0xff] }
0x159b   :  { %v3900_v16 = vpack.c.bf16 %v1084_v45, %v1083_v12  ;;  %v3188_v12 = vpack.c.bf16 %v1387_v14, %v1386_v11  ;;  %v1819_v11 = vld [vmem:[#allocation11 + $0x60] sm:$0xff]  ;;  %v1821_v14 = vld [vmem:[#allocation11 + $0x70] sm:$0xff] }
0x159d   :  { %3177 = vmatpush3.bf16.msra.mxu0 %v3900_v16 }
0x159e   :  { %3184 = vmatprep.subr.bf16.mxu0 %v3582_v0 }
0x15a0   :  { %2945 = vmatmul.mubr.f32.vlgmr.msra.gmra.mrb[10].mxu0 %v3584_v1 }
0x15a1   :  { %2966 = vmatprep.mubr.msk.f32.mxu0 %vm3583_vm0, %v3584_v1  ;;  %3186 = vmatpush3.bf16.msra.mxu0 %v3185_v8  ;;  %v1820_v8 = vld [vmem:[#allocation11 + $0x68] sm:$0xff] }
0x15a2   :  { %3187 = vmatprep.subr.bf16.mxu0 %v3582_v0 }
0x15a5   :  { %3189 = vmatpush3.bf16.msra.mxu0 %v3188_v12  ;;  %v3215_v12 = vpack.c.bf16 %v1820_v8, %v1819_v11  ;;  %v2181_v11 = vld [vmem:[#allocation11 + $0xa0] sm:$0xff]  ;;  %v2182_v8 = vld [vmem:[#allocation11 + $0xa8] sm:$0xff] }
0x15a6   :  { %3196 = vmatprep.subr.bf16.mxu0 %v3582_v0 }
0x1608   :  { %v1059_v2 = vpop.permute.xlu1 %1058 }
0x1609   :  { %v1061_v3 = vadd.f32 %v1059_v2, %v1051_v63 }
0x160b   :  { %3344 = vtanh.f32 %v1061_v3 }
0x160c   :  { %v1095_v4 = vpop.permute.xlu1 %1094 }
0x160d   :  { %2933 = vmatprep.mubr.msk.f32.mxu1 %vm217_vm5, %v1095_v4 }
0x1615   :  { %v3345_v18 = vpop.eup %3344 }
0x1616   :  { %1064 = vrot.lane.b32.xlu0 %v3345_v18, %s3585_s3 }
0x1673   :  { %v1243_v23 = vpop.f32.mrb[10].mxu0 }
0x1674   :  { %v2946_v24 = vpop.f32.mrb[11].mxu0 }
0x1688   :  { %v1065_v19 = vpop.permute.xlu0 %1064 }
0x1689   :  { %v1067_v20 = vmul.f32 %v1065_v19, %v1047_v60 }
0x168b   :  { %v1076_v21 = vsel %vm1072_vm8, %v1075_v49, %v1067_v20  ;;  %v1275_v49 = vld [vmem:[#allocation11 + $0x10] sm:$0xff] }
0x168c   :  { %1096 = vrot.lane.b32.xlu0 %v1076_v21, %s3586_s22  ;;  %v3194_v52 = vpack.c.bf16 %v1276_v50, %v1275_v49 }
0x16fe   :  { %v1097_v22 = vpop.permute.xlu0 %1096 }
0x16ff   :  { %2934 = vmatmul.mubr.msk.f32.vlgmr.msra.gmra.mrb[8].mxu1 %vm217_vm5, %v1097_v22 }
0x1700   :  { %3180 = vmatpush3.bf16.msra.mxu1 %v3897_v13  ;;  %2955 = vmatprep.mubr.msk.f32.mxu1 %vm3583_vm0, %v3584_v1 }
0x1701   :  { %3181 = vmatprep.subr.bf16.mxu1 %v3582_v0 }
0x1704   :  { %3183 = vmatpush3.bf16.msra.mxu1 %v3900_v16 }
0x1705   :  { %3190 = vmatprep.subr.bf16.mxu1 %v3582_v0 }
0x17d2   :  { %v2935_v27 = vpop.f32.mrb[8].mxu1 }
0x17d3   :  { %v3922_v28 = vadd.f32 %v2935_v27, %v2673_v25  ;;  %v1168_v29 = vpop.f32.mrb[9].mxu1 }
0x17d4   :  { %v3924_v30 = vadd.f32 %v2673_v25, %v1168_v29 }
0x17d6   :  { %v1247_v31 = vadd.f32 %v1243_v23, %v3924_v30 }
0x17d8   :  { %v2676_v32 = vmul.f32 -1.442695, %v1247_v31 }
0x17da   :  { %3346 = vpow2.f32 %v2676_v32 }
0x17db   :  { %3348 = vtanh.f32 %v1247_v31 }
0x17e4   :  { %v3347_v33 = vpop.eup %3346 }
0x17e5   :  { %v1252_v34 = vadd.f32 1.0, %v3347_v33  ;;  %v3349_v35 = vpop.eup %3348 }
0x17e7   :  { %3350 = vrcp.f32 %v1252_v34 }
0x17f1   :  { %v3351_v36 = vpop.eup %3350 }
0x17f2   :  { %v1255_v37 = vsel %vm3784_vm4, %v3349_v35, %v3351_v36 }
0x17f3   :  { %1258 = vrot.lane.b32.xlu1 %v1255_v37, %s3585_s3  ;;  %v1256_v17 = vmul.f32 0.0, %v1255_v37 }
0x1865   :  { %v1259_v38 = vpop.permute.xlu1 %1258 }
0x1866   :  { %v1261_v39 = vmul.f32 %v1259_v38, %v1255_v37 }
0x1868   :  { %1263 = vrot.lane.b32.xlu0 %v1261_v39, %s3586_s22 }
0x18da   :  { %v1264_v40 = vpop.permute.xlu0 %1263 }
0x18db   :  { %v1266_v41 = vadd.f32 %v1264_v40, %v1256_v17 }
0x18dd   :  { %3352 = vtanh.f32 %v1266_v41  ;;  %v1365_v4 = vrot.slane %v1266_v41, 6 }
0x18e7   :  { %v3353_v42 = vpop.eup %3352 }
0x18e8   :  { %1269 = vrot.lane.b32.xlu1 %v3353_v42, %s3585_s3 }
0x195a   :  { %v1270_v43 = vpop.permute.xlu1 %1269 }
0x195b   :  { %v1272_v44 = vmul.f32 %v1270_v43, %v1255_v37  ;;  %v1636_v43 = vld [vmem:[#allocation11 + $0x40] sm:$0xff] }
0x195d   :  { %1278 = vrot.lane.b32.xlu0 %v1272_v44, %s3586_s22  ;;  %v1637_v44 = vld [vmem:[#allocation11 + $0x48] sm:$0xff] }
0x195e   :  { %v3203_v47 = vpack.c.bf16 %v1637_v44, %v1636_v43  ;;  %v1999_v44 = vld [vmem:[#allocation11 + $0x80] sm:$0xff] }
0x19cf   :  { %v1279_v51 = vpop.permute.xlu0 %1278 }
0x19d0   :  { %2956 = vmatmul.mubr.msk.f32.vlgmr.msra.gmra.mrb[10].mxu1 %vm217_vm5, %v1279_v51 }
0x19d1   :  { %3192 = vmatpush3.bf16.msra.mxu1 %v3191_v48  ;;  %2977 = vmatprep.mubr.msk.f32.mxu1 %vm3583_vm0, %v3584_v1  ;;  %v1639_v48 = vld [vmem:[#allocation11 + $0x58] sm:$0xff] }
0x19d2   :  { %3193 = vmatprep.subr.bf16.mxu1 %v3582_v0  ;;  %v3206_v49 = vpack.c.bf16 %v1639_v48, %v1638_v46  ;;  %v2000_v46 = vld [vmem:[#allocation11 + $0x88] sm:$0xff] }
0x19d3   :  { %v3227_v48 = vpack.c.bf16 %v2000_v46, %v1999_v44  ;;  %v2365_v44 = vld [vmem:[#allocation11 + $0xc8] sm:$0xff]  ;;  %v2366_v46 = vld [vmem:[#allocation11 + $0xd0] sm:$0xff] }
0x19d5   :  { %3195 = vmatpush3.bf16.msra.mxu1 %v3194_v52 }
0x19d6   :  { %3202 = vmatprep.subr.bf16.mxu1 %v3582_v0 }
0x19d8   :  { %2978 = vmatmul.mubr.msk.f32.vlgmr.msra.gmra.mrb[12].mxu1 %vm217_vm5, %v1279_v51 }
0x19d9   :  { %2999 = vmatprep.mubr.msk.f32.mxu1 %vm3583_vm0, %v3584_v1  ;;  %3204 = vmatpush3.bf16.msra.mxu1 %v3203_v47  ;;  %v2001_v47 = vld [vmem:[#allocation11 + $0x90] sm:$0xff] }
0x19da   :  { %3205 = vmatprep.subr.bf16.mxu1 %v3582_v0 }
0x19dd   :  { %3207 = vmatpush3.bf16.msra.mxu1 %v3206_v49  ;;  %v2002_v49 = vld [vmem:[#allocation11 + $0x98] sm:$0xff] }
0x19de   :  { %3214 = vmatprep.subr.bf16.mxu1 %v3582_v0 }
0x1aa3   :  { %v1348_v53 = vpop.f32.mrb[10].mxu1 }
0x1aa4   :  { %v1353_v54 = vrot.slane %v1348_v53, 6  ;;  %v2957_v55 = vpop.f32.mrb[11].mxu1 }
0x1aa6   :  { %v1355_v56 = vadd.f32 %v1353_v54, %v3924_v30 }
0x1aa8   :  { %v2678_v57 = vmul.f32 -1.442695, %v1355_v56 }
0x1aaa   :  { %3354 = vpow2.f32 %v2678_v57 }
0x1aab   :  { %v1530_v58 = vpop.f32.mrb[12].mxu1  ;;  %3356 = vtanh.f32 %v1355_v56 }
0x1aac   :  { %v2979_v59 = vpop.f32.mrb[13].mxu1 }
0x1ab4   :  { %v3355_v60 = vpop.eup %3354 }
0x1ab5   :  { %v1360_v61 = vadd.f32 1.0, %v3355_v60  ;;  %v3357_v62 = vpop.eup %3356 }
0x1ab7   :  { %3358 = vrcp.f32 %v1360_v61 }
0x1ac1   :  { %v3359_v15 = vpop.eup %3358 }
0x1ac2   :  { %v1363_v63 = vsel %vm3784_vm4, %v3357_v62, %v3359_v15 }
0x1ac3   :  { %1369 = vrot.lane.b32.xlu1 %v1363_v63, %s3585_s3  ;;  %v1367_v5 = vmul.f32 %v1365_v4, %v1363_v63 }
0x1b35   :  { %v1370_v2 = vpop.permute.xlu1 %1369 }
0x1b36   :  { %v1372_v3 = vmul.f32 %v1370_v2, %v1363_v63 }
0x1b38   :  { %1374 = vrot.lane.b32.xlu0 %v1372_v3, %s3586_s22 }
0x1baa   :  { %v1375_v6 = vpop.permute.xlu0 %1374 }
0x1bab   :  { %v1377_v7 = vadd.f32 %v1375_v6, %v1367_v5 }
0x1bad   :  { %3360 = vtanh.f32 %v1377_v7  ;;  %v1617_v17 = vrot.slane %v1377_v7, 6 }
0x1bb7   :  { %v3361_v45 = vpop.eup %3360 }
0x1bb8   :  { %1380 = vrot.lane.b32.xlu1 %v3361_v45, %s3585_s3  ;;  %v1822_v45 = vld [vmem:[#allocation11 + $0x78] sm:$0xff] }
0x1c2a   :  { %v1381_v18 = vpop.permute.xlu1 %1380 }
0x1c2b   :  { %v1383_v19 = vmul.f32 %v1381_v18, %v1363_v63  ;;  %v3218_v18 = vpack.c.bf16 %v1822_v45, %v1821_v14  ;;  %v2183_v14 = vld [vmem:[#allocation11 + $0xb0] sm:$0xff]  ;;  %v2184_v45 = vld [vmem:[#allocation11 + $0xb8] sm:$0xff] }
0x1c2d   :  { %v1389_v20 = vrot.slane %v1383_v19, 2 }
0x1c2f   :  { %1390 = vrot.lane.b32.xlu0 %v1389_v20, %s3586_s22 }
0x1ca1   :  { %v1391_v21 = vpop.permute.xlu0 %1390 }
0x1ca2   :  { %2967 = vmatmul.mubr.msk.f32.vlgmr.msra.gmra.mrb[12].mxu0 %vm217_vm5, %v1391_v21 }
0x1ca3   :  { %3198 = vmatpush3.bf16.msra.mxu0 %v3897_v13  ;;  %2988 = vmatprep.mubr.msk.f32.mxu0 %vm3583_vm0, %v3584_v1 }
0x1ca4   :  { %3199 = vmatprep.subr.bf16.mxu0 %v3582_v0 }
0x1ca7   :  { %3201 = vmatpush3.bf16.msra.mxu0 %v3900_v16 }
0x1ca8   :  { %3208 = vmatprep.subr.bf16.mxu0 %v3582_v0 }
0x1caa   :  { %2989 = vmatmul.mubr.msk.f32.vlgmr.msra.gmra.mrb[14].mxu0 %vm217_vm5, %v1391_v21 }
0x1cab   :  { %3210 = vmatpush3.bf16.msra.mxu0 %v3897_v13  ;;  %3010 = vmatprep.mubr.msk.f32.mxu0 %vm3583_vm0, %v3584_v1 }
0x1cac   :  { %3211 = vmatprep.subr.bf16.mxu0 %v3582_v0 }
0x1caf   :  { %3213 = vmatpush3.bf16.msra.mxu0 %v3900_v16 }
0x1cb0   :  { %3220 = vmatprep.subr.bf16.mxu0 %v3582_v0 }
0x1d75   :  { %v1460_v22 = vpop.f32.mrb[12].mxu0 }
0x1d76   :  { %v1531_v23 = vadd.f32 %v1530_v58, %v1460_v22  ;;  %v2968_v24 = vpop.f32.mrb[13].mxu0 }
0x1d7d   :  { %v1600_v25 = vpop.f32.mrb[14].mxu0 }
0x1d7e   :  { %v1605_v27 = vrot.slane %v1600_v25, 4  ;;  %v2990_v29 = vpop.f32.mrb[15].mxu0 }
0x1d80   :  { %v1607_v31 = vadd.f32 %v1605_v27, %v3924_v30 }
0x1d82   :  { %v2682_v32 = vmul.f32 -1.442695, %v1607_v31 }
0x1d84   :  { %3362 = vpow2.f32 %v2682_v32 }
0x1d85   :  { %3364 = vtanh.f32 %v1607_v31 }
0x1d8e   :  { %v3363_v33 = vpop.eup %3362 }
0x1d8f   :  { %v1612_v34 = vadd.f32 1.0, %v3363_v33  ;;  %v3365_v35 = vpop.eup %3364 }
0x1d91   :  { %3366 = vrcp.f32 %v1612_v34 }
0x1d9b   :  { %v3367_v36 = vpop.eup %3366 }
0x1d9c   :  { %v1615_v37 = vsel %vm3784_vm4, %v3365_v35, %v3367_v36 }
0x1d9d   :  { %1621 = vrot.lane.b32.xlu1 %v1615_v37, %s3585_s3  ;;  %v1619_v40 = vmul.f32 %v1617_v17, %v1615_v37 }
0x1e0f   :  { %v1622_v38 = vpop.permute.xlu1 %1621 }
0x1e10   :  { %v1624_v39 = vmul.f32 %v1622_v38, %v1615_v37 }
0x1e12   :  { %1626 = vrot.lane.b32.xlu0 %v1624_v39, %s3586_s22 }
0x1e84   :  { %v1627_v41 = vpop.permute.xlu0 %1626 }
0x1e85   :  { %v1629_v42 = vadd.f32 %v1627_v41, %v1619_v40 }
0x1e87   :  { %3368 = vtanh.f32 %v1629_v42  ;;  %v1800_v7 = vrot.slane %v1629_v42, 6 }
0x1e91   :  { %v3369_v50 = vpop.eup %3368 }
0x1e92   :  { %1632 = vrot.lane.b32.xlu1 %v3369_v50, %s3585_s3  ;;  %v3230_v50 = vpack.c.bf16 %v2002_v49, %v2001_v47 }
0x1f04   :  { %v1633_v51 = vpop.permute.xlu1 %1632 }
0x1f05   :  { %v1635_v52 = vmul.f32 %v1633_v51, %v1615_v37 }
0x1f07   :  { %v1641_v53 = vrot.slane %v1635_v52, 4 }
0x1f09   :  { %1642 = vrot.lane.b32.xlu0 %v1641_v53, %s3586_s22 }
0x1f7b   :  { %v1643_v54 = vpop.permute.xlu0 %1642 }
0x1f7c   :  { %3000 = vmatmul.mubr.msk.f32.vlgmr.msra.gmra.mrb[14].mxu1 %vm217_vm5, %v1643_v54  ;;  %3011 = vmatmul.mubr.msk.f32.vlgmr.msra.gmra.mrb[16].mxu0 %vm217_vm5, %v1643_v54 }
0x1f7d   :  { %3222 = vmatpush3.bf16.msra.mxu0 %v3897_v13  ;;  %3021 = vmatprep.mubr.msk.f32.mxu1 %vm3583_vm0, %v3584_v1 }
0x1f7e   :  { %3223 = vmatprep.subr.bf16.mxu0 %v3582_v0  ;;  %3032 = vmatprep.mubr.msk.f32.mxu0 %vm3583_vm0, %v3584_v1 }
0x1f7f   :  { %3216 = vmatpush3.bf16.msra.mxu1 %v3215_v12  ;;  %v3239_v12 = vpack.c.bf16 %v2182_v8, %v2181_v11  ;;  %v2549_v11 = vld [vmem:[#allocation11 + $0xf0] sm:$0xff] }
0x1f80   :  { %3217 = vmatprep.subr.bf16.mxu1 %v3582_v0 }
0x1f81   :  { %3225 = vmatpush3.bf16.msra.mxu0 %v3900_v16 }
0x1f82   :  { %3232 = vmatprep.subr.bf16.mxu0 %v3582_v0 }
0x1f83   :  { %3219 = vmatpush3.bf16.msra.mxu1 %v3218_v18  ;;  %v3242_v18 = vpack.c.bf16 %v2184_v45, %v2183_v14  ;;  %v2550_v14 = vld [vmem:[#allocation11 + $0xf8] sm:$0xff] }
0x1f84   :  { %3226 = vmatprep.subr.bf16.mxu1 %v3582_v0 }
0x204f   :  { %v1712_v55 = vpop.f32.mrb[14].mxu1  ;;  %v1783_v56 = vpop.f32.mrb[16].mxu0 }
0x2050   :  { %v1716_v57 = vadd.f32 %v1712_v55, %v1531_v23  ;;  %v1788_v58 = vrot.slane %v1783_v56, 2  ;;  %v3001_v59 = vpop.f32.mrb[15].mxu1  ;;  %v3012_v60 = vpop.f32.mrb[17].mxu0 }
0x2052   :  { %v1790_v61 = vadd.f32 %v1788_v58, %v3924_v30 }
0x2054   :  { %v2685_v62 = vmul.f32 -1.442695, %v1790_v61 }
0x2056   :  { %3370 = vpow2.f32 %v2685_v62 }
0x2057   :  { %3372 = vtanh.f32 %v1790_v61 }
0x2060   :  { %v3371_v15 = vpop.eup %3370 }
0x2061   :  { %v1795_v63 = vadd.f32 1.0, %v3371_v15  ;;  %v3373_v2 = vpop.eup %3372 }
0x2063   :  { %3374 = vrcp.f32 %v1795_v63 }
0x206d   :  { %v3375_v3 = vpop.eup %3374 }
0x206e   :  { %v1798_v4 = vsel %vm3784_vm4, %v3373_v2, %v3375_v3 }
0x206f   :  { %1804 = vrot.lane.b32.xlu1 %v1798_v4, %s3585_s3  ;;  %v1802_v9 = vmul.f32 %v1800_v7, %v1798_v4 }
0x20e1   :  { %v1805_v5 = vpop.permute.xlu1 %1804 }
0x20e2   :  { %v1807_v6 = vmul.f32 %v1805_v5, %v1798_v4 }
0x20e4   :  { %1809 = vrot.lane.b32.xlu0 %v1807_v6, %s3586_s22 }
0x2156   :  { %v1810_v30 = vpop.permute.xlu0 %1809 }
0x2157   :  { %v1812_v10 = vadd.f32 %v1810_v30, %v1802_v9 }
0x2159   :  { %3376 = vtanh.f32 %v1812_v10  ;;  %v1980_v40 = vrot.slane %v1812_v10, 6 }
0x2163   :  { %v3377_v19 = vpop.eup %3376 }
0x2164   :  { %1815 = vrot.lane.b32.xlu1 %v3377_v19, %s3585_s3 }
0x21d6   :  { %v1816_v20 = vpop.permute.xlu1 %1815 }
0x21d7   :  { %v1818_v21 = vmul.f32 %v1816_v20, %v1798_v4 }
0x21d9   :  { %v1824_v22 = vrot.slane %v1818_v21, 6 }
0x21db   :  { %1825 = vrot.lane.b32.xlu0 %v1824_v22, %s3586_s22 }
0x224d   :  { %v1826_v23 = vpop.permute.xlu0 %1825 }
0x224e   :  { %3022 = vmatmul.mubr.msk.f32.vlgmr.msra.gmra.mrb[16].mxu1 %vm217_vm5, %v1826_v23  ;;  %3033 = vmatmul.mubr.msk.f32.vlgmr.msra.gmra.mrb[18].mxu0 %vm217_vm5, %v1826_v23 }
0x224f   :  { %3234 = vmatpush3.bf16.msra.mxu0 %v3897_v13  ;;  %3043 = vmatprep.mubr.msk.f32.mxu1 %vm3583_vm0, %v3584_v1 }
0x2250   :  { %3235 = vmatprep.subr.bf16.mxu0 %v3582_v0  ;;  %3054 = vmatprep.mubr.msk.f32.mxu0 %vm3583_vm0, %v3584_v1 }
0x2251   :  { %3228 = vmatpush3.bf16.msra.mxu1 %v3227_v48  ;;  %v2367_v48 = vld [vmem:[#allocation11 + $0xd8] sm:$0xff] }
0x2252   :  { %3229 = vmatprep.subr.bf16.mxu1 %v3582_v0  ;;  %v3254_v49 = vpack.c.bf16 %v2367_v48, %v2366_v46 }
0x2253   :  { %3237 = vmatpush3.bf16.msra.mxu0 %v3900_v16 }
0x2254   :  { %3244 = vmatprep.subr.bf16.mxu0 %v3582_v0 }
0x2255   :  { %3231 = vmatpush3.bf16.msra.mxu1 %v3230_v50 }
0x2256   :  { %3238 = vmatprep.subr.bf16.mxu1 %v3582_v0 }
0x2321   :  { %v1895_v24 = vpop.f32.mrb[16].mxu1  ;;  %v1966_v25 = vpop.f32.mrb[18].mxu0 }
0x2322   :  { %v1899_v27 = vadd.f32 %v1895_v24, %v1716_v57  ;;  %v1970_v29 = vadd.f32 %v1966_v25, %v3922_v28  ;;  %v3023_v31 = vpop.f32.mrb[17].mxu1  ;;  %v3034_v32 = vpop.f32.mrb[19].mxu0 }
0x2324   :  { %v2688_v33 = vmul.f32 -1.442695, %v1970_v29 }
0x2326   :  { %3378 = vpow2.f32 %v2688_v33 }
0x2327   :  { %3380 = vtanh.f32 %v1970_v29 }
0x2330   :  { %v3379_v34 = vpop.eup %3378 }
0x2331   :  { %v1975_v35 = vadd.f32 1.0, %v3379_v34  ;;  %v3381_v36 = vpop.eup %3380 }
0x2333   :  { %3382 = vrcp.f32 %v1975_v35 }
0x233d   :  { %v3383_v37 = vpop.eup %3382 }
0x233e   :  { %v1978_v38 = vsel %vm3784_vm4, %v3381_v36, %v3383_v37 }
0x233f   :  { %1984 = vrot.lane.b32.xlu1 %v1978_v38, %s3585_s3  ;;  %v1982_v41 = vmul.f32 %v1980_v40, %v1978_v38 }
0x23b1   :  { %v1985_v39 = vpop.permute.xlu1 %1984 }
0x23b2   :  { %v1987_v17 = vmul.f32 %v1985_v39, %v1978_v38 }
0x23b4   :  { %1989 = vrot.lane.b32.xlu0 %v1987_v17, %s3586_s22 }
0x2426   :  { %v1990_v42 = vpop.permute.xlu0 %1989 }
0x2427   :  { %v1992_v43 = vadd.f32 %v1990_v42, %v1982_v41 }
0x2429   :  { %3384 = vtanh.f32 %v1992_v43  ;;  %v2162_v7 = vrot.slane %v1992_v43, 6  ;;  %v2364_v43 = vld [vmem:[#allocation11 + $0xc0] sm:$0xff] }
0x242a   :  { %v3251_v47 = vpack.c.bf16 %v2365_v44, %v2364_v43 }
0x2433   :  { %v3385_v51 = vpop.eup %3384 }
0x2434   :  { %1995 = vrot.lane.b32.xlu1 %v3385_v51, %s3585_s3 }
0x24a6   :  { %v1996_v52 = vpop.permute.xlu1 %1995 }
0x24a7   :  { %v1998_v53 = vmul.f32 %v1996_v52, %v1978_v38 }
0x24a9   :  { %2004 = vrot.lane.b32.xlu0 %v1998_v53, %s3586_s22 }
0x251b   :  { %v2005_v54 = vpop.permute.xlu0 %2004 }
0x251c   :  { %3044 = vmatmul.mubr.msk.f32.vlgmr.msra.gmra.mrb[18].mxu1 %vm217_vm5, %v2005_v54  ;;  %3055 = vmatmul.mubr.msk.f32.vlgmr.msra.gmra.mrb[20].mxu0 %vm217_vm5, %v2005_v54 }
0x251d   :  { %3246 = vmatpush3.bf16.msra.mxu0 %v3897_v13  ;;  %3065 = vmatprep.mubr.msk.f32.mxu1 %vm3583_vm0, %v3584_v1 }
0x251e   :  { %3247 = vmatprep.subr.bf16.mxu0 %v3582_v0  ;;  %3076 = vmatprep.mubr.msk.f32.mxu0 %vm3583_vm0, %v3584_v1 }
0x251f   :  { %3240 = vmatpush3.bf16.msra.mxu1 %v3239_v12  ;;  %v3266_v12 = vpack.c.bf16 %v2550_v14, %v2549_v11 }
0x2520   :  { %3241 = vmatprep.subr.bf16.mxu1 %v3582_v0 }
0x2521   :  { %3249 = vmatpush3.bf16.msra.mxu0 %v3900_v16 }
0x2522   :  { %3256 = vmatprep.subr.bf16.mxu0 %v3582_v0 }
0x2523   :  { %3243 = vmatpush3.bf16.msra.mxu1 %v3242_v18 }
0x2524   :  { %3250 = vmatprep.subr.bf16.mxu1 %v3582_v0 }
0x25ef   :  { %v2074_v55 = vpop.f32.mrb[18].mxu1  ;;  %v2145_v56 = vpop.f32.mrb[20].mxu0 }
0x25f0   :  { %v2078_v57 = vadd.f32 %v2074_v55, %v1899_v27  ;;  %v2150_v58 = vrot.slane %v2145_v56, 6  ;;  %v3045_v59 = vpop.f32.mrb[19].mxu1  ;;  %v3056_v60 = vpop.f32.mrb[21].mxu0 }
0x25f2   :  { %v2152_v61 = vadd.f32 %v2150_v58, %v3922_v28 }
0x25f4   :  { %v2691_v62 = vmul.f32 -1.442695, %v2152_v61 }
0x25f6   :  { %3386 = vpow2.f32 %v2691_v62 }
0x25f7   :  { %3388 = vtanh.f32 %v2152_v61 }
0x2600   :  { %v3387_v15 = vpop.eup %3386 }
0x2601   :  { %v2157_v63 = vadd.f32 1.0, %v3387_v15  ;;  %v3389_v2 = vpop.eup %3388 }
0x2603   :  { %3390 = vrcp.f32 %v2157_v63 }
0x260d   :  { %v3391_v3 = vpop.eup %3390 }
0x260e   :  { %v2160_v4 = vsel %vm3784_vm4, %v3389_v2, %v3391_v3 }
0x260f   :  { %2166 = vrot.lane.b32.xlu1 %v2160_v4, %s3585_s3  ;;  %v2164_v9 = vmul.f32 %v2162_v7, %v2160_v4 }
0x2681   :  { %v2167_v5 = vpop.permute.xlu1 %2166 }
0x2682   :  { %v2169_v6 = vmul.f32 %v2167_v5, %v2160_v4 }
0x2684   :  { %2171 = vrot.lane.b32.xlu0 %v2169_v6, %s3586_s22 }
0x26f6   :  { %v2172_v30 = vpop.permute.xlu0 %2171 }
0x26f7   :  { %v2174_v10 = vadd.f32 %v2172_v30, %v2164_v9  ;;  %v2547_v30 = vld [vmem:[#allocation11 + $0xe0] sm:$0xff] }
0x26f9   :  { %3392 = vtanh.f32 %v2174_v10  ;;  %v2345_v17 = vrot.slane %v2174_v10, 6  ;;  %v2548_v10 = vld [vmem:[#allocation11 + $0xe8] sm:$0xff] }
0x26fa   :  { %v3263_v8 = vpack.c.bf16 %v2548_v10, %v2547_v30 }
0x2703   :  { %v3393_v19 = vpop.eup %3392 }
0x2704   :  { %2177 = vrot.lane.b32.xlu1 %v3393_v19, %s3585_s3 }
0x2776   :  { %v2178_v20 = vpop.permute.xlu1 %2177 }
0x2777   :  { %v2180_v21 = vmul.f32 %v2178_v20, %v2160_v4 }
0x2779   :  { %v2186_v22 = vrot.slane %v2180_v21, 2 }
0x277b   :  { %2187 = vrot.lane.b32.xlu0 %v2186_v22, %s3586_s22  ;;  %v2699_v22 = vld [vmem:[%s4084_s8] ss:$0 sm:$0xff] }
0x27ed   :  { %v2188_v23 = vpop.permute.xlu0 %2187 }
0x27ee   :  { %3066 = vmatmul.mubr.msk.f32.vlgmr.msra.gmra.mrb[20].mxu1 %vm217_vm5, %v2188_v23  ;;  %3077 = vmatmul.mubr.msk.f32.vlgmr.msra.gmra.mrb[22].mxu0 %vm217_vm5, %v2188_v23 }
0x27ef   :  { %3258 = vmatpush3.bf16.msra.mxu0 %v3897_v13  ;;  %3087 = vmatprep.mubr.msk.f32.mxu1 %vm3583_vm0, %v3584_v1 }
0x27f0   :  { %3259 = vmatprep.subr.bf16.mxu0 %v3582_v0  ;;  %3098 = vmatprep.mubr.msk.f32.mxu0 %vm3583_vm0, %v3584_v1 }
0x27f1   :  { %3252 = vmatpush3.bf16.msra.mxu1 %v3251_v47 }
0x27f2   :  { %3253 = vmatprep.subr.bf16.mxu1 %v3582_v0 }
0x27f3   :  { %3261 = vmatpush3.bf16.msra.mxu0 %v3900_v16 }
0x27f5   :  { %3255 = vmatpush3.bf16.msra.mxu1 %v3254_v49 }
0x27f6   :  { %3262 = vmatprep.subr.bf16.mxu1 %v3582_v0 }
0x28c1   :  { %v2257_v24 = vpop.f32.mrb[20].mxu1  ;;  %v2328_v25 = vpop.f32.mrb[22].mxu0 }
0x28c2   :  { %v2261_v27 = vadd.f32 %v2257_v24, %v2078_v57  ;;  %v2333_v29 = vrot.slane %v2328_v25, 4  ;;  %v3067_v31 = vpop.f32.mrb[21].mxu1  ;;  %v3078_v32 = vpop.f32.mrb[23].mxu0 }
0x28c4   :  { %v2335_v33 = vadd.f32 %v2333_v29, %v3922_v28 }
0x28c6   :  { %v2694_v34 = vmul.f32 -1.442695, %v2335_v33 }
0x28c8   :  { %3394 = vpow2.f32 %v2694_v34 }
0x28c9   :  { %3396 = vtanh.f32 %v2335_v33 }
0x28d2   :  { %v3395_v13 = vpop.eup %3394 }
0x28d3   :  { %v2340_v35 = vadd.f32 1.0, %v3395_v13  ;;  %v3397_v36 = vpop.eup %3396 }
0x28d5   :  { %3398 = vrcp.f32 %v2340_v35 }
0x28df   :  { %v3399_v37 = vpop.eup %3398 }
0x28e0   :  { %v2343_v38 = vsel %vm3784_vm4, %v3397_v36, %v3399_v37 }
0x28e1   :  { %2349 = vrot.lane.b32.xlu1 %v2343_v38, %s3585_s3  ;;  %v2347_v40 = vmul.f32 %v2345_v17, %v2343_v38 }
0x2953   :  { %v2350_v16 = vpop.permute.xlu1 %2349 }
0x2954   :  { %v2352_v39 = vmul.f32 %v2350_v16, %v2343_v38 }
0x2956   :  { %2354 = vrot.lane.b32.xlu0 %v2352_v39, %s3586_s22 }
0x29c8   :  { %v2355_v41 = vpop.permute.xlu0 %2354 }
0x29c9   :  { %v2357_v42 = vadd.f32 %v2355_v41, %v2347_v40 }
0x29cb   :  { %3400 = vtanh.f32 %v2357_v42  ;;  %v2528_v6 = vrot.slane %v2357_v42, 6 }
0x29d5   :  { %v3401_v50 = vpop.eup %3400 }
0x29d6   :  { %2360 = vrot.lane.b32.xlu1 %v3401_v50, %s3585_s3 }
0x2a48   :  { %v2361_v51 = vpop.permute.xlu1 %2360 }
0x2a49   :  { %v2363_v52 = vmul.f32 %v2361_v51, %v2343_v38 }
0x2a4b   :  { %v2369_v53 = vrot.slane %v2363_v52, 4 }
0x2a4d   :  { %2370 = vrot.lane.b32.xlu0 %v2369_v53, %s3586_s22 }
0x2abf   :  { %v2371_v54 = vpop.permute.xlu0 %2370 }
0x2ac0   :  { %3088 = vmatmul.mubr.msk.f32.vlgmr.msra.gmra.mrb[22].mxu1 %vm217_vm5, %v2371_v54  ;;  %3099 = vmatmul.mubr.msk.f32.vlgmr.msra.gmra.mrb[24].mxu0 %vm217_vm5, %v2371_v54 }
0x2ac1   :  { %3109 = vmatprep.mubr.msk.f32.mxu1 %vm3583_vm0, %v3584_v1  ;;  %3264 = vmatpush3.bf16.msra.mxu1 %v3263_v8 }
0x2ac2   :  { %3265 = vmatprep.subr.bf16.mxu1 %v3582_v0 }
0x2ac5   :  { %3267 = vmatpush3.bf16.msra.mxu1 %v3266_v12 }
0x2b93   :  { %v2440_v55 = vpop.f32.mrb[22].mxu1  ;;  %v2511_v56 = vpop.f32.mrb[24].mxu0 }
0x2b94   :  { %v2444_v57 = vadd.f32 %v2440_v55, %v2261_v27  ;;  %v2516_v58 = vrot.slane %v2511_v56, 2  ;;  %v3089_v59 = vpop.f32.mrb[23].mxu1  ;;  %v3100_v60 = vpop.f32.mrb[25].mxu0 }
0x2b96   :  { %v2518_v61 = vadd.f32 %v2516_v58, %v3922_v28 }
0x2b98   :  { %v2697_v62 = vmul.f32 -1.442695, %v2518_v61 }
0x2b9a   :  { %3402 = vpow2.f32 %v2697_v62 }
0x2b9b   :  { %3404 = vtanh.f32 %v2518_v61 }
0x2ba4   :  { %v3403_v15 = vpop.eup %3402 }
0x2ba5   :  { %v2523_v63 = vadd.f32 1.0, %v3403_v15  ;;  %v3405_v2 = vpop.eup %3404 }
0x2ba7   :  { %3406 = vrcp.f32 %v2523_v63 }
0x2bb1   :  { %v3407_v3 = vpop.eup %3406 }
0x2bb2   :  { %v2526_v4 = vsel %vm3784_vm4, %v3405_v2, %v3407_v3 }
0x2bb3   :  { %2532 = vrot.lane.b32.xlu1 %v2526_v4, %s3585_s3  ;;  %v2530_v7 = vmul.f32 %v2528_v6, %v2526_v4 }
0x2c25   :  { %v2533_v1 = vpop.permute.xlu1 %2532 }
0x2c26   :  { %v2535_v5 = vmul.f32 %v2533_v1, %v2526_v4 }
0x2c28   :  { %2537 = vrot.lane.b32.xlu0 %v2535_v5, %s3586_s22 }
0x2c9a   :  { %v2538_v28 = vpop.permute.xlu0 %2537 }
0x2c9b   :  { %v2540_v9 = vadd.f32 %v2538_v28, %v2530_v7 }
0x2c9d   :  { %3408 = vtanh.f32 %v2540_v9 }
0x2ca7   :  { %v3409_v26 = vpop.eup %3408 }
0x2ca8   :  { %2543 = vrot.lane.b32.xlu1 %v3409_v26, %s3585_s3 }
0x2d1a   :  { %v2544_v45 = vpop.permute.xlu1 %2543 }
0x2d1b   :  { %v2546_v18 = vmul.f32 %v2544_v45, %v2526_v4 }
0x2d1d   :  { %v2552_v19 = vrot.slane %v2546_v18, 6 }
0x2d1f   :  { %2553 = vrot.lane.b32.xlu0 %v2552_v19, %s3586_s22 }
0x2d91   :  { %v2554_v20 = vpop.permute.xlu0 %2553 }
0x2d92   :  { %3110 = vmatmul.mubr.msk.f32.vlgmr.msra.gmra.mrb[24].mxu1 %vm217_vm5, %v2554_v20 }
0x2e65   :  { %v2623_v21 = vpop.f32.mrb[24].mxu1 }
0x2e66   :  { %v2627_v0 = vadd.f32 %v2623_v21, %v2444_v57  ;;  %v3111_v23 = vpop.f32.mrb[25].mxu1 }
0x2e68   :  { %v2635_v24 = vadd.f32 %v2699_v22, %v2627_v0 }
0x2e6a   :  { %2636 = vst [vmem:[#allocation13] sm:$0x3] %v2635_v24 }
0x2e6b   :  { %3553 = shalt.err (!%p3550_p10)
}
0x2e6c   :  { %s3554_s4 = scalar_lea.hbm %s4085_s9, 32 }
0x2e6d   :  { %p3555_p11 = scmp.ne.s32.totalorder %s4085_s9, %s3554_s4  ;;  %p3558_p12 = scmp.lt.u32.totalorder %s3554_s4, %s4085_s9 }
0x2e6f   :  { %p3560_p13 = pnand %p3558_p12, %p3555_p11 }
0x2e71   :  { %3563 = shalt.err (!%p3560_p13)
}
0x2e72   :  { %2646 = dma.vmem_to_hbm [thread:$0]  %s2644_s23, 32, %s4085_s9, [#allocation4]  }
0x2e73   :  { %3572 = dma.done.wait [#allocation4], 32  }
0x2e74   :  { %3573 = vsyncadd [#allocation4], 4294967264 }
0x2e75   :  { %2650 = vsyncpa [#allocation3], 1 }
0x2e76   :  { %2651 = vsyncpa [#allocation6], 1 }
0x2e77   :  { %2652 = vsyncpa [#allocation9], 1 }
0x2e78   :  { %2653 = vsyncpa [#allocation12], 1 }
0x2e79   :  { %2654 = vsyncpa [#allocation4], 1 }

</bundles_post_ra>
